<compile_context>
chip_gen: v7x
topology: tpu7x:2x2x1
jax: 0.10.0
libtpu: 0.0.40
codegen_flags: <defaults>
</compile_context>

<pallas_src>
import functools
import math

import jax
import jax.numpy as jnp
from jax.experimental import pallas as pl
from jax.experimental.pallas import tpu as pltpu


def isoflop_width_control(f_in, f_out, sparsity):
    rank = sparsity * (3 * 3 * f_in * f_out) / (3 * 3 * f_in + f_out)
    return int(math.floor(rank))


# ------------------------------- kernel ------------------------------------- #

def _doped_conv3x3_kernel(x_ref, w_ref, o_ref, xpad_ref, *, wp, img_h, img_w):
    """Fused 3x3 conv, one image per grid step.

    x_ref    : (Cin, H, W)        unpadded image (f32 from HBM)
    w_ref    : (Cout, 9*Cin)      folded weight, columns ordered tap-major
                                  (tap t = kh*3 + kw), Cin-minor
    o_ref    : (Cout, Lout)       Lout = H * Wp (padded-row-stride output; the
                                  row-wrap columns are cropped by the wrapper)
    xpad_ref : (Cin, Hp*Wp) VMEM  padded image, spatial plane flat on lanes
    """
    lout = o_ref.shape[-1]

    # ---- in-kernel padding: zero the scratch, then copy the interior rows ----
    # Zeroed every step so megacore grid sharding stays correct.
    # TODO(synk): zero only the halo ring instead of the whole scratch.
    xpad_ref[...] = jnp.zeros(xpad_ref.shape, xpad_ref.dtype)
    for hh in range(img_h):
        start = (hh + 1) * wp + 1                       # static lane offset
        xpad_ref[:, start:start + img_w] = (
            x_ref[:, hh, :].astype(xpad_ref.dtype))     # bf16 cast in-kernel

    # ---- im2col: 9 lane-shifted windows stacked on sublanes -> one deep dot ----
    taps = [xpad_ref[:, kh * wp + kw: kh * wp + kw + lout]
            for kh in range(3) for kw in range(3)]      # 9 x (Cin, Lout)
    rhs = jnp.concatenate(taps, axis=0)                 # (9*Cin, Lout)

    o_ref[...] = jnp.dot(w_ref[...], rhs,
                         preferred_element_type=jnp.float32).astype(o_ref.dtype)


# ------------------------------- wrapper ------------------------------------ #

def doped_conv3x3_forward(x, sparse_w, u_w, v_w, *, stride=1,
                          mxu_dtype=jnp.bfloat16):
    """DopedConv3x3.forward.  x: (N, Cin, H, W) NCHW, weights in OIHW.

    Returns (out, dynamic_weight_norm): `out` matches the PyTorch forward return
    value; the norm mirrors the self.dynamic_weight_norm side effect.
    """
    N, Cin, H, W = x.shape
    Cout = sparse_w.shape[0]
    rank = u_w.shape[0]
    prec = jax.lax.Precision.HIGHEST

    # ---- fold V @ U into the sparse 3x3 weight (plain JAX; weight-sized only) ----
    u2 = u_w.reshape(rank, Cin * 9).astype(jnp.float32)
    v2 = v_w.reshape(Cout, rank).astype(jnp.float32)
    w_lr2 = jnp.matmul(v2, u2, precision=prec)               # (Cout, Cin*9)
    dynamic_weight_norm = jnp.sum(w_lr2 * w_lr2)             # compute_weight_norm()
    w_eff = sparse_w.astype(jnp.float32) + w_lr2.reshape(Cout, Cin, 3, 3)
    # (Cout, Cin, 3, 3) -> (Cout, kh, kw, Cin) -> (Cout, 9*Cin), matching rhs rows.
    w_flat = jnp.transpose(w_eff, (0, 2, 3, 1)).reshape(Cout, 9 * Cin)
    w_flat = w_flat.astype(mxu_dtype)

    # ---- padded-plane geometry (padding itself happens inside the kernel) ----
    # Wp = W+2 is the padded row stride; one extra zero row at the bottom so the
    # largest tap offset (2*Wp + 2) never reads past the end of the flat buffer.
    wp = W + 2
    hp = H + 3
    lin = hp * wp
    lout = H * wp

    cost = pl.CostEstimate(
        flops=2 * N * Cout * 9 * Cin * lout,
        transcendentals=0,
        bytes_accessed=(N * Cin * H * W * x.dtype.itemsize
                        + N * Cout * lout * 4
                        + Cout * 9 * Cin * jnp.dtype(mxu_dtype).itemsize))

    out_flat = pl.pallas_call(
        functools.partial(_doped_conv3x3_kernel, wp=wp, img_h=H, img_w=W),
        out_shape=jax.ShapeDtypeStruct((N, Cout, lout), jnp.float32),
        grid=(N,),
        in_specs=[
            pl.BlockSpec((None, Cin, H, W), lambda n: (n, 0, 0, 0)),
            pl.BlockSpec((Cout, 9 * Cin), lambda n: (0, 0)),
        ],
        out_specs=pl.BlockSpec((None, Cout, lout), lambda n: (n, 0, 0)),
        scratch_shapes=[pltpu.VMEM((Cin, lin), mxu_dtype)],
        compiler_params=pltpu.CompilerParams(
            dimension_semantics=("parallel",)),
        cost_estimate=cost,
    )(x, w_flat)

    # Crop the row-wrap columns and apply the stride in ONE consumer-side slice
    # (kernel stores stay lane-dense; important on v5e's single vst slot).
    out = out_flat.reshape(N, Cout, H, wp)[:, :, ::stride, :W:stride]
    return out, dynamic_weight_norm


# ------------------------------ reference ----------------------------------- #

def _reference(x, sparse_w, u_w, v_w, stride=1):
    dn = ("NCHW", "OIHW", "NCHW")
    prec = jax.lax.Precision.HIGHEST

    def conv(v, w, s, pad):
        return jax.lax.conv_general_dilated(
            v, w, window_strides=(s, s), padding=pad,
            dimension_numbers=dn, precision=prec)

    sparse_out = conv(x, sparse_w, stride, ((1, 1), (1, 1)))
    low = conv(x, u_w, stride, ((1, 1), (1, 1)))
    low = conv(low, v_w, 1, ((0, 0), (0, 0)))
    out = sparse_out + low
    u2 = u_w.reshape(u_w.shape[0], -1)
    v2 = v_w.reshape(v_w.shape[0], -1)
    norm = jnp.sum(jnp.matmul(v2, u2, precision=prec) ** 2)
    return out, norm


# -------------------------------- main -------------------------------------- #

if __name__ == "__main__":
    N, C, H, W = 2, 8, 16, 16
    sparsity = 0.5
    rank = isoflop_width_control(C, C, sparsity)          # -> 3
    assert rank >= 1

    key = jax.random.PRNGKey(0)
    k = jax.random.split(key, 4)
    x = jax.random.normal(k[0], (N, C, H, W), jnp.float32)
    # sparse_conv ~ default Conv2d init scale; U/V ~ kaiming_normal(fan_out, relu)
    sparse_w = jax.random.normal(k[1], (C, C, 3, 3), jnp.float32) / jnp.sqrt(C * 9.0)
    u_w = jax.random.normal(k[2], (rank, C, 3, 3), jnp.float32) * jnp.sqrt(2.0 / (rank * 9.0))
    v_w = jax.random.normal(k[3], (C, rank, 1, 1), jnp.float32) * jnp.sqrt(2.0 / C)

    ref_out, ref_norm = _reference(x, sparse_w, u_w, v_w)

    # Default path: bf16 MXU operands, f32 accumulation (recommended on all gens).
    fwd = jax.jit(doped_conv3x3_forward)
    out, norm = fwd(x, sparse_w, u_w, v_w)
    jax.block_until_ready((out, norm))
    assert out.shape == (N, C, H, W) and out.dtype == jnp.float32
    assert jnp.allclose(out, ref_out, rtol=1e-1, atol=1e-1), "conv mismatch (bf16)"
    assert jnp.allclose(norm, ref_norm, rtol=1e-5, atol=1e-5), "weight-norm mismatch"

    # f32 MXU-operand path: tight check of the kernel semantics.
    fwd_f32 = jax.jit(functools.partial(doped_conv3x3_forward, mxu_dtype=jnp.float32))
    out_f32, _ = fwd_f32(x, sparse_w, u_w, v_w)
    jax.block_until_ready(out_f32)
    assert jnp.allclose(out_f32, ref_out, rtol=1e-3, atol=1e-3), "conv mismatch (f32)"

    # Strided path (crop + stride fused into one slice; exact by subsampling).
    ref_s2, _ = _reference(x, sparse_w, u_w, v_w, stride=2)
    out_s2, _ = jax.jit(functools.partial(doped_conv3x3_forward, stride=2))(
        x, sparse_w, u_w, v_w)
    jax.block_until_ready(out_s2)
    assert out_s2.shape == ref_s2.shape
    assert jnp.allclose(out_s2, ref_s2, rtol=1e-1, atol=1e-1), "conv mismatch (stride 2)"

    print("KERNEL_OK")
</pallas_src>

<mosaic_0001>
module attributes {stable_mosaic.version = 11 : i64} {
  func.func @_doped_conv3x3_kernel(%arg0: i32, %arg1: memref<1x8x16x16xf32, #tpu.memory_space<vmem>>, %arg2: memref<8x72xbf16, #tpu.memory_space<vmem>>, %arg3: memref<1x8x288xf32, #tpu.memory_space<vmem>>, %arg4: memref<8x342xbf16, #tpu.memory_space<vmem>>) attributes {dimension_semantics = [#tpu.dimension_semantics<parallel>], iteration_bounds = array<i64: 2>, scalar_prefetch = 0 : i64, scratch_operands = 1 : i64, tpu.core_type = #tpu.core_type<tc>, window_params = [{transform_indices = @transform_0, window_bounds = array<i64: 1, 8, 16, 16>}, {pipeline_mode = #tpu.pipeline_mode<synchronous>, transform_indices = @transform_1, window_bounds = array<i64: 8, 72>}, {transform_indices = @transform_2, window_bounds = array<i64: 1, 8, 288>}]} {
    %cst = arith.constant 0.000000e+00 : bf16
    %0 = vector.broadcast %cst : bf16 to vector<8x342xbf16>
    %c0 = arith.constant 0 : index
    %c0_0 = arith.constant 0 : index
    %1 = vector.load %arg4[%c0, %c0_0] : memref<8x342xbf16, #tpu.memory_space<vmem>>, vector<8x342xbf16>
    tpu.vector_store %arg4[%c0, %c0_0], %0 {strides = array<i32>} : memref<8x342xbf16, #tpu.memory_space<vmem>>, vector<8x342xbf16>,
    %c0_1 = arith.constant 0 : index
    %c0_2 = arith.constant 0 : index
    %c0_3 = arith.constant 0 : index
    %c0_4 = arith.constant 0 : index
    %2 = vector.load %arg1[%c0_1, %c0_2, %c0_3, %c0_4] : memref<1x8x16x16xf32, #tpu.memory_space<vmem>>, vector<1x8x1x16xf32>
    %3 = vector.shape_cast %2 : vector<1x8x1x16xf32> to vector<8x16xf32>
    %4 = arith.truncf %3 : vector<8x16xf32> to vector<8x16xbf16>
    %c0_5 = arith.constant 0 : index
    %c19 = arith.constant 19 : index
    %5 = vector.load %arg4[%c0_5, %c19] : memref<8x342xbf16, #tpu.memory_space<vmem>>, vector<8x16xbf16>
    tpu.vector_store %arg4[%c0_5, %c19], %4 {strides = array<i32>} : memref<8x342xbf16, #tpu.memory_space<vmem>>, vector<8x16xbf16>,
    %c0_6 = arith.constant 0 : index
    %c0_7 = arith.constant 0 : index
    %c1 = arith.constant 1 : index
    %c0_8 = arith.constant 0 : index
    %6 = vector.load %arg1[%c0_6, %c0_7, %c1, %c0_8] : memref<1x8x16x16xf32, #tpu.memory_space<vmem>>, vector<1x8x1x16xf32>
    %7 = vector.shape_cast %6 : vector<1x8x1x16xf32> to vector<8x16xf32>
    %8 = arith.truncf %7 : vector<8x16xf32> to vector<8x16xbf16>
    %c0_9 = arith.constant 0 : index
    %c37 = arith.constant 37 : index
    %9 = vector.load %arg4[%c0_9, %c37] : memref<8x342xbf16, #tpu.memory_space<vmem>>, vector<8x16xbf16>
    tpu.vector_store %arg4[%c0_9, %c37], %8 {strides = array<i32>} : memref<8x342xbf16, #tpu.memory_space<vmem>>, vector<8x16xbf16>,
    %c0_10 = arith.constant 0 : index
    %c0_11 = arith.constant 0 : index
    %c2 = arith.constant 2 : index
    %c0_12 = arith.constant 0 : index
    %10 = vector.load %arg1[%c0_10, %c0_11, %c2, %c0_12] : memref<1x8x16x16xf32, #tpu.memory_space<vmem>>, vector<1x8x1x16xf32>
    %11 = vector.shape_cast %10 : vector<1x8x1x16xf32> to vector<8x16xf32>
    %12 = arith.truncf %11 : vector<8x16xf32> to vector<8x16xbf16>
    %c0_13 = arith.constant 0 : index
    %c55 = arith.constant 55 : index
    %13 = vector.load %arg4[%c0_13, %c55] : memref<8x342xbf16, #tpu.memory_space<vmem>>, vector<8x16xbf16>
    tpu.vector_store %arg4[%c0_13, %c55], %12 {strides = array<i32>} : memref<8x342xbf16, #tpu.memory_space<vmem>>, vector<8x16xbf16>,
    %c0_14 = arith.constant 0 : index
    %c0_15 = arith.constant 0 : index
    %c3 = arith.constant 3 : index
    %c0_16 = arith.constant 0 : index
    %14 = vector.load %arg1[%c0_14, %c0_15, %c3, %c0_16] : memref<1x8x16x16xf32, #tpu.memory_space<vmem>>, vector<1x8x1x16xf32>
    %15 = vector.shape_cast %14 : vector<1x8x1x16xf32> to vector<8x16xf32>
    %16 = arith.truncf %15 : vector<8x16xf32> to vector<8x16xbf16>
    %c0_17 = arith.constant 0 : index
    %c73 = arith.constant 73 : index
    %17 = vector.load %arg4[%c0_17, %c73] : memref<8x342xbf16, #tpu.memory_space<vmem>>, vector<8x16xbf16>
    tpu.vector_store %arg4[%c0_17, %c73], %16 {strides = array<i32>} : memref<8x342xbf16, #tpu.memory_space<vmem>>, vector<8x16xbf16>,
    %c0_18 = arith.constant 0 : index
    %c0_19 = arith.constant 0 : index
    %c4 = arith.constant 4 : index
    %c0_20 = arith.constant 0 : index
    %18 = vector.load %arg1[%c0_18, %c0_19, %c4, %c0_20] : memref<1x8x16x16xf32, #tpu.memory_space<vmem>>, vector<1x8x1x16xf32>
    %19 = vector.shape_cast %18 : vector<1x8x1x16xf32> to vector<8x16xf32>
    %20 = arith.truncf %19 : vector<8x16xf32> to vector<8x16xbf16>
    %c0_21 = arith.constant 0 : index
    %c91 = arith.constant 91 : index
    %21 = vector.load %arg4[%c0_21, %c91] : memref<8x342xbf16, #tpu.memory_space<vmem>>, vector<8x16xbf16>
    tpu.vector_store %arg4[%c0_21, %c91], %20 {strides = array<i32>} : memref<8x342xbf16, #tpu.memory_space<vmem>>, vector<8x16xbf16>,
    %c0_22 = arith.constant 0 : index
    %c0_23 = arith.constant 0 : index
    %c5 = arith.constant 5 : index
    %c0_24 = arith.constant 0 : index
    %22 = vector.load %arg1[%c0_22, %c0_23, %c5, %c0_24] : memref<1x8x16x16xf32, #tpu.memory_space<vmem>>, vector<1x8x1x16xf32>
    %23 = vector.shape_cast %22 : vector<1x8x1x16xf32> to vector<8x16xf32>
    %24 = arith.truncf %23 : vector<8x16xf32> to vector<8x16xbf16>
    %c0_25 = arith.constant 0 : index
    %c109 = arith.constant 109 : index
    %25 = vector.load %arg4[%c0_25, %c109] : memref<8x342xbf16, #tpu.memory_space<vmem>>, vector<8x16xbf16>
    tpu.vector_store %arg4[%c0_25, %c109], %24 {strides = array<i32>} : memref<8x342xbf16, #tpu.memory_space<vmem>>, vector<8x16xbf16>,
    %c0_26 = arith.constant 0 : index
    %c0_27 = arith.constant 0 : index
    %c6 = arith.constant 6 : index
    %c0_28 = arith.constant 0 : index
    %26 = vector.load %arg1[%c0_26, %c0_27, %c6, %c0_28] : memref<1x8x16x16xf32, #tpu.memory_space<vmem>>, vector<1x8x1x16xf32>
    %27 = vector.shape_cast %26 : vector<1x8x1x16xf32> to vector<8x16xf32>
    %28 = arith.truncf %27 : vector<8x16xf32> to vector<8x16xbf16>
    %c0_29 = arith.constant 0 : index
    %c127 = arith.constant 127 : index
    %29 = vector.load %arg4[%c0_29, %c127] : memref<8x342xbf16, #tpu.memory_space<vmem>>, vector<8x16xbf16>
    tpu.vector_store %arg4[%c0_29, %c127], %28 {strides = array<i32>} : memref<8x342xbf16, #tpu.memory_space<vmem>>, vector<8x16xbf16>,
    %c0_30 = arith.constant 0 : index
    %c0_31 = arith.constant 0 : index
    %c7 = arith.constant 7 : index
    %c0_32 = arith.constant 0 : index
    %30 = vector.load %arg1[%c0_30, %c0_31, %c7, %c0_32] : memref<1x8x16x16xf32, #tpu.memory_space<vmem>>, vector<1x8x1x16xf32>
    %31 = vector.shape_cast %30 : vector<1x8x1x16xf32> to vector<8x16xf32>
    %32 = arith.truncf %31 : vector<8x16xf32> to vector<8x16xbf16>
    %c0_33 = arith.constant 0 : index
    %c145 = arith.constant 145 : index
    %33 = vector.load %arg4[%c0_33, %c145] : memref<8x342xbf16, #tpu.memory_space<vmem>>, vector<8x16xbf16>
    tpu.vector_store %arg4[%c0_33, %c145], %32 {strides = array<i32>} : memref<8x342xbf16, #tpu.memory_space<vmem>>, vector<8x16xbf16>,
    %c0_34 = arith.constant 0 : index
    %c0_35 = arith.constant 0 : index
    %c8 = arith.constant 8 : index
    %c0_36 = arith.constant 0 : index
    %34 = vector.load %arg1[%c0_34, %c0_35, %c8, %c0_36] : memref<1x8x16x16xf32, #tpu.memory_space<vmem>>, vector<1x8x1x16xf32>
    %35 = vector.shape_cast %34 : vector<1x8x1x16xf32> to vector<8x16xf32>
    %36 = arith.truncf %35 : vector<8x16xf32> to vector<8x16xbf16>
    %c0_37 = arith.constant 0 : index
    %c163 = arith.constant 163 : index
    %37 = vector.load %arg4[%c0_37, %c163] : memref<8x342xbf16, #tpu.memory_space<vmem>>, vector<8x16xbf16>
    tpu.vector_store %arg4[%c0_37, %c163], %36 {strides = array<i32>} : memref<8x342xbf16, #tpu.memory_space<vmem>>, vector<8x16xbf16>,
    %c0_38 = arith.constant 0 : index
    %c0_39 = arith.constant 0 : index
    %c9 = arith.constant 9 : index
    %c0_40 = arith.constant 0 : index
    %38 = vector.load %arg1[%c0_38, %c0_39, %c9, %c0_40] : memref<1x8x16x16xf32, #tpu.memory_space<vmem>>, vector<1x8x1x16xf32>
    %39 = vector.shape_cast %38 : vector<1x8x1x16xf32> to vector<8x16xf32>
    %40 = arith.truncf %39 : vector<8x16xf32> to vector<8x16xbf16>
    %c0_41 = arith.constant 0 : index
    %c181 = arith.constant 181 : index
    %41 = vector.load %arg4[%c0_41, %c181] : memref<8x342xbf16, #tpu.memory_space<vmem>>, vector<8x16xbf16>
    tpu.vector_store %arg4[%c0_41, %c181], %40 {strides = array<i32>} : memref<8x342xbf16, #tpu.memory_space<vmem>>, vector<8x16xbf16>,
    %c0_42 = arith.constant 0 : index
    %c0_43 = arith.constant 0 : index
    %c10 = arith.constant 10 : index
    %c0_44 = arith.constant 0 : index
    %42 = vector.load %arg1[%c0_42, %c0_43, %c10, %c0_44] : memref<1x8x16x16xf32, #tpu.memory_space<vmem>>, vector<1x8x1x16xf32>
    %43 = vector.shape_cast %42 : vector<1x8x1x16xf32> to vector<8x16xf32>
    %44 = arith.truncf %43 : vector<8x16xf32> to vector<8x16xbf16>
    %c0_45 = arith.constant 0 : index
    %c199 = arith.constant 199 : index
    %45 = vector.load %arg4[%c0_45, %c199] : memref<8x342xbf16, #tpu.memory_space<vmem>>, vector<8x16xbf16>
    tpu.vector_store %arg4[%c0_45, %c199], %44 {strides = array<i32>} : memref<8x342xbf16, #tpu.memory_space<vmem>>, vector<8x16xbf16>,
    %c0_46 = arith.constant 0 : index
    %c0_47 = arith.constant 0 : index
    %c11 = arith.constant 11 : index
    %c0_48 = arith.constant 0 : index
    %46 = vector.load %arg1[%c0_46, %c0_47, %c11, %c0_48] : memref<1x8x16x16xf32, #tpu.memory_space<vmem>>, vector<1x8x1x16xf32>
    %47 = vector.shape_cast %46 : vector<1x8x1x16xf32> to vector<8x16xf32>
    %48 = arith.truncf %47 : vector<8x16xf32> to vector<8x16xbf16>
    %c0_49 = arith.constant 0 : index
    %c217 = arith.constant 217 : index
    %49 = vector.load %arg4[%c0_49, %c217] : memref<8x342xbf16, #tpu.memory_space<vmem>>, vector<8x16xbf16>
    tpu.vector_store %arg4[%c0_49, %c217], %48 {strides = array<i32>} : memref<8x342xbf16, #tpu.memory_space<vmem>>, vector<8x16xbf16>,
    %c0_50 = arith.constant 0 : index
    %c0_51 = arith.constant 0 : index
    %c12 = arith.constant 12 : index
    %c0_52 = arith.constant 0 : index
    %50 = vector.load %arg1[%c0_50, %c0_51, %c12, %c0_52] : memref<1x8x16x16xf32, #tpu.memory_space<vmem>>, vector<1x8x1x16xf32>
    %51 = vector.shape_cast %50 : vector<1x8x1x16xf32> to vector<8x16xf32>
    %52 = arith.truncf %51 : vector<8x16xf32> to vector<8x16xbf16>
    %c0_53 = arith.constant 0 : index
    %c235 = arith.constant 235 : index
    %53 = vector.load %arg4[%c0_53, %c235] : memref<8x342xbf16, #tpu.memory_space<vmem>>, vector<8x16xbf16>
    tpu.vector_store %arg4[%c0_53, %c235], %52 {strides = array<i32>} : memref<8x342xbf16, #tpu.memory_space<vmem>>, vector<8x16xbf16>,
    %c0_54 = arith.constant 0 : index
    %c0_55 = arith.constant 0 : index
    %c13 = arith.constant 13 : index
    %c0_56 = arith.constant 0 : index
    %54 = vector.load %arg1[%c0_54, %c0_55, %c13, %c0_56] : memref<1x8x16x16xf32, #tpu.memory_space<vmem>>, vector<1x8x1x16xf32>
    %55 = vector.shape_cast %54 : vector<1x8x1x16xf32> to vector<8x16xf32>
    %56 = arith.truncf %55 : vector<8x16xf32> to vector<8x16xbf16>
    %c0_57 = arith.constant 0 : index
    %c253 = arith.constant 253 : index
    %57 = vector.load %arg4[%c0_57, %c253] : memref<8x342xbf16, #tpu.memory_space<vmem>>, vector<8x16xbf16>
    tpu.vector_store %arg4[%c0_57, %c253], %56 {strides = array<i32>} : memref<8x342xbf16, #tpu.memory_space<vmem>>, vector<8x16xbf16>,
    %c0_58 = arith.constant 0 : index
    %c0_59 = arith.constant 0 : index
    %c14 = arith.constant 14 : index
    %c0_60 = arith.constant 0 : index
    %58 = vector.load %arg1[%c0_58, %c0_59, %c14, %c0_60] : memref<1x8x16x16xf32, #tpu.memory_space<vmem>>, vector<1x8x1x16xf32>
    %59 = vector.shape_cast %58 : vector<1x8x1x16xf32> to vector<8x16xf32>
    %60 = arith.truncf %59 : vector<8x16xf32> to vector<8x16xbf16>
    %c0_61 = arith.constant 0 : index
    %c271 = arith.constant 271 : index
    %61 = vector.load %arg4[%c0_61, %c271] : memref<8x342xbf16, #tpu.memory_space<vmem>>, vector<8x16xbf16>
    tpu.vector_store %arg4[%c0_61, %c271], %60 {strides = array<i32>} : memref<8x342xbf16, #tpu.memory_space<vmem>>, vector<8x16xbf16>,
    %c0_62 = arith.constant 0 : index
    %c0_63 = arith.constant 0 : index
    %c15 = arith.constant 15 : index
    %c0_64 = arith.constant 0 : index
    %62 = vector.load %arg1[%c0_62, %c0_63, %c15, %c0_64] : memref<1x8x16x16xf32, #tpu.memory_space<vmem>>, vector<1x8x1x16xf32>
    %63 = vector.shape_cast %62 : vector<1x8x1x16xf32> to vector<8x16xf32>
    %64 = arith.truncf %63 : vector<8x16xf32> to vector<8x16xbf16>
    %c0_65 = arith.constant 0 : index
    %c289 = arith.constant 289 : index
    %65 = vector.load %arg4[%c0_65, %c289] : memref<8x342xbf16, #tpu.memory_space<vmem>>, vector<8x16xbf16>
    tpu.vector_store %arg4[%c0_65, %c289], %64 {strides = array<i32>} : memref<8x342xbf16, #tpu.memory_space<vmem>>, vector<8x16xbf16>,
    %c0_66 = arith.constant 0 : index
    %c0_67 = arith.constant 0 : index
    %66 = vector.load %arg4[%c0_66, %c0_67] : memref<8x342xbf16, #tpu.memory_space<vmem>>, vector<8x288xbf16>
    %c0_68 = arith.constant 0 : index
    %c1_69 = arith.constant 1 : index
    %67 = vector.load %arg4[%c0_68, %c1_69] : memref<8x342xbf16, #tpu.memory_space<vmem>>, vector<8x288xbf16>
    %c0_70 = arith.constant 0 : index
    %c2_71 = arith.constant 2 : index
    %68 = vector.load %arg4[%c0_70, %c2_71] : memref<8x342xbf16, #tpu.memory_space<vmem>>, vector<8x288xbf16>
    %c0_72 = arith.constant 0 : index
    %c18 = arith.constant 18 : index
    %69 = vector.load %arg4[%c0_72, %c18] : memref<8x342xbf16, #tpu.memory_space<vmem>>, vector<8x288xbf16>
    %c0_73 = arith.constant 0 : index
    %c19_74 = arith.constant 19 : index
    %70 = vector.load %arg4[%c0_73, %c19_74] : memref<8x342xbf16, #tpu.memory_space<vmem>>, vector<8x288xbf16>
    %c0_75 = arith.constant 0 : index
    %c20 = arith.constant 20 : index
    %71 = vector.load %arg4[%c0_75, %c20] : memref<8x342xbf16, #tpu.memory_space<vmem>>, vector<8x288xbf16>
    %c0_76 = arith.constant 0 : index
    %c36 = arith.constant 36 : index
    %72 = vector.load %arg4[%c0_76, %c36] : memref<8x342xbf16, #tpu.memory_space<vmem>>, vector<8x288xbf16>
    %c0_77 = arith.constant 0 : index
    %c37_78 = arith.constant 37 : index
    %73 = vector.load %arg4[%c0_77, %c37_78] : memref<8x342xbf16, #tpu.memory_space<vmem>>, vector<8x288xbf16>
    %c0_79 = arith.constant 0 : index
    %c38 = arith.constant 38 : index
    %74 = vector.load %arg4[%c0_79, %c38] : memref<8x342xbf16, #tpu.memory_space<vmem>>, vector<8x288xbf16>
    %75 = tpu.concatenate %66, %67, %68, %69, %70, %71, %72, %73, %74 in 0 : vector<8x288xbf16>, vector<8x288xbf16>, vector<8x288xbf16>, vector<8x288xbf16>, vector<8x288xbf16>, vector<8x288xbf16>, vector<8x288xbf16>, vector<8x288xbf16>, vector<8x288xbf16> -> vector<72x288xbf16>
    %c0_80 = arith.constant 0 : index
    %c0_81 = arith.constant 0 : index
    %76 = vector.load %arg2[%c0_80, %c0_81] : memref<8x72xbf16, #tpu.memory_space<vmem>>, vector<8x72xbf16>
    %cst_82 = arith.constant dense<0.000000e+00> : vector<8x288xf32>
    %77 = tpu.matmul %76, %75, %cst_82 {dimension_numbers = #tpu.dot_dimension_numbers<[1], [0], [0], [1], [0, 0, 1, 1], [], []>} : vector<8x72xbf16>, vector<72x288xbf16>, vector<8x288xf32> -> vector<8x288xf32>
    %c0_83 = arith.constant 0 : index
    %c0_84 = arith.constant 0 : index
    %c0_85 = arith.constant 0 : index
    %78 = vector.load %arg3[%c0_83, %c0_84, %c0_85] : memref<1x8x288xf32, #tpu.memory_space<vmem>>, vector<1x8x288xf32>
    %79 = vector.shape_cast %78 : vector<1x8x288xf32> to vector<8x288xf32>
    %80 = vector.shape_cast %77 : vector<8x288xf32> to vector<1x8x288xf32>
    tpu.vector_store %arg3[%c0_83, %c0_84, %c0_85], %80 {strides = array<i32>} : memref<1x8x288xf32, #tpu.memory_space<vmem>>, vector<1x8x288xf32>,
    return
  }
  func.func @transform_0(%arg0: i32) -> (i32, i32, i32, i32) {
    %c0_i32 = arith.constant 0 : i32
    %c0_i32_0 = arith.constant 0 : i32
    %c0_i32_1 = arith.constant 0 : i32
    %c0_i32_2 = arith.constant 0 : i32
    return %arg0, %c0_i32, %c0_i32_0, %c0_i32_1 : i32, i32, i32, i32
  }
  func.func @transform_1(%arg0: i32) -> (i32, i32) {
    %c0_i32 = arith.constant 0 : i32
    %c0_i32_0 = arith.constant 0 : i32
    %c0_i32_1 = arith.constant 0 : i32
    return %c0_i32, %c0_i32_0 : i32, i32
  }
  func.func @transform_2(%arg0: i32) -> (i32, i32, i32) {
    %c0_i32 = arith.constant 0 : i32
    %c0_i32_0 = arith.constant 0 : i32
    %c0_i32_1 = arith.constant 0 : i32
    return %arg0, %c0_i32, %c0_i32_0 : i32, i32, i32
  }
}

</mosaic_0001>

<bundles_post_ra>
// kernel: doped_conv3x3_forward.1
= control target key start
LH: loop header
LB: loop body
LE: loop exit
PB: predicated region body
PF: predicated region fallthrough
CT: control target
= control target key end

     0   :  { %s1913_s9 = smov 0   ;;  %s2221_s0 = inlined_call_operand.vmem [shape: f32[2,8,16,16], index: 0, kind: input, shape index: {}]   ;;  %s2222_s1 = inlined_call_operand.vmem [shape: bf16[8,72], index: 1, kind: input, shape index: {}]   ;;  %s2223_s2 = inlined_call_operand.vmem [shape: f32[2,8,288], index: 2, kind: output, shape index: {}]  }
   0x1 LB: > { %s1537_s10 = sadd.s32 4294967295, %s1872_s9   ;;  %p1541_p0 = scmp.ge.s32.totalorder %s1872_s9, 1  ;;  %s1872_s9 = sphi %s1913_s9, %s12_s9  }
   0x2   : > { %p112_p1 = scmp.lt.s32.totalorder %s1872_s9, 3 }
   0x4   : > { %p113_p2 = pnand %p1541_p0, %p112_p1 }
   0x5   : > { %p134_p3 = scmp.lt.s32.totalorder (!%p113_p2), %s1537_s10, 1  ;;  %vm197_vm0 = vcmask (!%p113_p2), 1041409   ;;  %vm200_vm1 = vcmask (!%p113_p2), 1042434   ;;  %vm203_vm2 = vcmask (!%p113_p2), 1043459   ;;  %vm206_vm3 = vcmask (!%p113_p2), 1044484   ;;  %s1874_s15 = smov (!%p113_p2), 55  }
   0x6   : > { %116 = sbr.rel (%p113_p2) target bundleno = 637 (0x27d), region = 28  ;;  %vm209_vm4 = vcmask (!%p113_p2), 1045509   ;;  %vm212_vm5 = vcmask (!%p113_p2), 1046534   ;;  %vm215_vm6 = vcmask (!%p113_p2), 1047559   ;;  %s1875_s16 = smov (!%p113_p2), 19   ;;  %vm146_vm7 = vcmask (!%p113_p2), 699392  }
   0x7   : > { %s1876_s17 = smov (!%p113_p2), 73   ;;  %s1877_s18 = smov (!%p113_p2), 37   ;;  %vm221_vm8 = vcmask (!%p113_p2), 281752   ;;  %vm289_vm9 = vcmask (!%p113_p2), 429352   ;;  %vm357_vm10 = vcmask (!%p113_p2), 576952   ;;  %vm425_vm11 = vcmask (!%p113_p2), 724552  }
   0x8   : > { %s1878_s19 = smov (!%p113_p2), 91   ;;  %s1879_s20 = smov (!%p113_p2), 127   ;;  %vm493_vm12 = vcmask (!%p113_p2), 872152   ;;  %vm632_vm13 = vcmask (!%p113_p2), 1044472   ;;  %vm633_vm14 = vcmask (!%p113_p2), 121860   ;;  %vm629_vm15 = vcmask (!%p113_p2), 1039360  }
   0x9   : > { %s1880_s21 = smov (!%p113_p2), 17   ;;  %s1881_s22 = smov (!%p113_p2), 109  }
   0xa   : > { %s1882_s23 = smov (!%p113_p2), 53   ;;  %s1883_s24 = smov (!%p113_p2), 35  }
   0xb   : > { %s1884_s25 = smov (!%p113_p2), 125   ;;  %s1885_s26 = smov (!%p113_p2), 71  }
   0xc   : > { %s1886_s27 = smov (!%p113_p2), 89   ;;  %s1887_s28 = smov (!%p113_p2), 107  }
   0xd   : > { %s2225_s10 = smov (!%p134_p3, %s1537_s10), 1  ;;  %s1888_s29 = smov 15  }
   0xe   : > { %s1681_s11 = sshll.u32 %s2225_s10, 7  ;;  %s1890_s30 = smov 33  }
   0xf   : > { %s1927_s14 = scalar_lea.vmem %s2221_s0, %s1681_s11  ;;  %s1891_s3 = smov 126  }
  0x10   : > { %v291_v0 = vld [vmem:[%s1927_s14 + $0x2] sm:$0x1]  ;;  %v292_v1 = vld [vmem:[%s1927_s14 + $0x12] sm:$0x1]  ;;  %v148_v14 = vld [vmem:[%s1927_s14] sm:$0x1] }
  0x11   : > { %v293_v2 = vld [vmem:[%s1927_s14 + $0x22] sm:$0x1]  ;;  %v294_v3 = vld [vmem:[%s1927_s14 + $0x32] sm:$0x1]  ;;  %v1698_v6 = vpack.c.bf16 %v291_v0, %v291_v0  ;;  %v1699_v7 = vpack.c.bf16 %v292_v1, %v292_v1  ;;  %v149_v19 = vld [vmem:[%s1927_s14 + $0x10] sm:$0x1]  ;;  %v1682_v32 = vpack.c.bf16 %v148_v14, %v148_v14 }
  0x12   : > { %v295_v4 = vld [vmem:[%s1927_s14 + $0x42] sm:$0x1]  ;;  %v296_v5 = vld [vmem:[%s1927_s14 + $0x52] sm:$0x1]  ;;  %v1700_v8 = vpack.c.bf16 %v293_v2, %v293_v2  ;;  %v1701_v11 = vpack.c.bf16 %v294_v3, %v294_v3  ;;  %v150_v24 = vld [vmem:[%s1927_s14 + $0x20] sm:$0x1]  ;;  %v1683_v41 = vpack.c.bf16 %v149_v19, %v149_v19 }
  0x13   : > { %v297_v9 = vld [vmem:[%s1927_s14 + $0x62] sm:$0x1]  ;;  %v298_v10 = vld [vmem:[%s1927_s14 + $0x72] sm:$0x1]  ;;  %v1702_v12 = vpack.c.bf16 %v295_v4, %v295_v4  ;;  %v1703_v13 = vpack.c.bf16 %v296_v5, %v296_v5  ;;  %v331_v17 = vunpack.c.l.b16 %v1698_v6  ;;  %v332_v18 = vunpack.c.l.b16 %v1699_v7  ;;  %v151_v25 = vld [vmem:[%s1927_s14 + $0x30] sm:$0x1] }
  0x14   : > { %v1704_v15 = vpack.c.bf16 %v297_v9, %v297_v9  ;;  %v1705_v16 = vpack.c.bf16 %v298_v10, %v298_v10  ;;  %v333_v20 = vunpack.c.l.b16 %v1700_v8  ;;  %v334_v21 = vunpack.c.l.b16 %v1701_v11  ;;  %v152_v26 = vld [vmem:[%s1927_s14 + $0x40] sm:$0x1]  ;;  %v153_v30 = vld [vmem:[%s1927_s14 + $0x50] sm:$0x1]  ;;  %v359_v58 = vld [vmem:[%s1927_s14 + $0x3] sm:$0x1] }
  0x15   : > { %v335_v22 = vunpack.c.l.b16 %v1702_v12  ;;  %v336_v23 = vunpack.c.l.b16 %v1703_v13  ;;  %v339_v29 = vrot.slane %v332_v18, 7  ;;  %v154_v31 = vld [vmem:[%s1927_s14 + $0x60] sm:$0x1]  ;;  %v155_v37 = vld [vmem:[%s1927_s14 + $0x70] sm:$0x1]  ;;  %v1684_v43 = vpack.c.bf16 %v150_v24, %v150_v24  ;;  %s1892_s4 = smov 110  }
  0x16   : > { %v337_v27 = vunpack.c.l.b16 %v1704_v15  ;;  %v338_v28 = vunpack.c.l.b16 %v1705_v16  ;;  %v341_v33 = vrot.slane %v333_v20, 6  ;;  %v343_v34 = vrot.slane %v334_v21, 5  ;;  %v360_v59 = vld [vmem:[%s1927_s14 + $0x13] sm:$0x1]  ;;  %v361_v60 = vld [vmem:[%s1927_s14 + $0x23] sm:$0x1] }
  0x17   : > { %v345_v35 = vrot.slane %v335_v22, 4  ;;  %v347_v36 = vrot.slane %v336_v23, 3  ;;  %v340_v38 = vsel %vm197_vm0, %v339_v29, %v331_v17  ;;  %v1685_v44 = vpack.c.bf16 %v151_v25, %v151_v25  ;;  %v362_v1 = vld [vmem:[%s1927_s14 + $0x33] sm:$0x1]  ;;  %v363_v2 = vld [vmem:[%s1927_s14 + $0x43] sm:$0x1] }
  0x18   : > { %v349_v39 = vrot.slane %v337_v27, 2  ;;  %v351_v40 = vrot.slane %v338_v28, 1  ;;  %v342_v42 = vsel %vm200_vm1, %v341_v33, %v340_v38  ;;  %v1686_v45 = vpack.c.bf16 %v152_v26, %v152_v26  ;;  %v364_v7 = vld [vmem:[%s1927_s14 + $0x53] sm:$0x1]  ;;  %v365_v12 = vld [vmem:[%s1927_s14 + $0x63] sm:$0x1] }
  0x19   : > { %v344_v46 = vsel %vm203_vm2, %v343_v34, %v342_v42  ;;  %v1687_v47 = vpack.c.bf16 %v153_v30, %v153_v30  ;;  %v1688_v48 = vpack.c.bf16 %v154_v31, %v154_v31  ;;  %v1689_v49 = vpack.c.bf16 %v155_v37, %v155_v37  ;;  %v366_v13 = vld [vmem:[%s1927_s14 + $0x73] sm:$0x1]  ;;  %v223_v30 = vld [vmem:[%s1927_s14 + $0x1] sm:$0x1]  ;;  %v226_v37 = vld [vmem:[%s1927_s14 + $0x31] sm:$0x1] }
  0x1a   : > { %v346_v50 = vsel %vm206_vm3, %v345_v35, %v344_v46  ;;  %v188_v51 = vunpack.c.l.b16 %v1682_v32  ;;  %v189_v52 = vunpack.c.l.b16 %v1683_v41  ;;  %v190_v53 = vunpack.c.l.b16 %v1684_v43  ;;  %v224_v35 = vld [vmem:[%s1927_s14 + $0x11] sm:$0x1]  ;;  %v227_v42 = vld [vmem:[%s1927_s14 + $0x41] sm:$0x1]  ;;  %s1894_s5 = smov 108   ;;  %s1895_s6 = smov 92  }
  0x1b   : > { %v348_v54 = vsel %vm209_vm4, %v347_v36, %v346_v50  ;;  %v191_v55 = vunpack.c.l.b16 %v1685_v44  ;;  %v192_v56 = vunpack.c.l.b16 %v1686_v45  ;;  %v193_v57 = vunpack.c.l.b16 %v1687_v47  ;;  %v225_v36 = vld [vmem:[%s1927_s14 + $0x21] sm:$0x1]  ;;  %v228_v43 = vld [vmem:[%s1927_s14 + $0x51] sm:$0x1]  ;;  %s1897_s7 = smov 90   ;;  %s1830_s12 = smul.u32 24, %s2225_s10 }
  0x1c   : > { %v350_v61 = vsel %vm212_vm5, %v349_v39, %v348_v54  ;;  %v194_v62 = vunpack.c.l.b16 %v1688_v48  ;;  %v195_v63 = vunpack.c.l.b16 %v1689_v49  ;;  %v196_v0 = vrot.slane %v189_v52, 7  ;;  %v229_v48 = vld [vmem:[%s1927_s14 + $0x61] sm:$0x1] }
  0x1d   : > { %v352_v3 = vsel %vm215_vm6, %v351_v40, %v350_v61  ;;  %v199_v4 = vrot.slane %v190_v53, 6  ;;  %v202_v5 = vrot.slane %v191_v55, 5  ;;  %v205_v6 = vrot.slane %v192_v56, 4  ;;  %v230_v53 = vld [vmem:[%s1927_s14 + $0x71] sm:$0x1] }
  0x1e   : > { %v353_v8 = vpack.c.b16 %v352_v3, %v352_v3  ;;  %v198_v9 = vsel %vm197_vm0, %v196_v0, %v188_v51  ;;  %v208_v10 = vrot.slane %v193_v57, 3  ;;  %v211_v11 = vrot.slane %v194_v62, 2 }
  0x1f   : > { %v201_v14 = vsel %vm200_vm1, %v199_v4, %v198_v9  ;;  %v214_v15 = vrot.slane %v195_v63, 1  ;;  %v1706_v16 = vpack.c.bf16 %v359_v58, %v359_v58  ;;  %v1707_v17 = vpack.c.bf16 %v360_v59, %v360_v59 }
  0x20   : > { %354 = vrot.lane.b32.xlu1 %v353_v8, %s1874_s15  ;;  %v204_v18 = vsel %vm203_vm2, %v202_v5, %v201_v14  ;;  %v1708_v19 = vpack.c.bf16 %v361_v60, %v361_v60  ;;  %v1709_v20 = vpack.c.bf16 %v362_v1, %v362_v1  ;;  %v1710_v21 = vpack.c.bf16 %v363_v2, %v363_v2  ;;  %s143_s15 = scalar_lea.vmem %s2223_s2, %s1830_s12 }
  0x21   : > { %v207_v22 = vsel %vm206_vm3, %v205_v6, %v204_v18  ;;  %v1711_v23 = vpack.c.bf16 %v364_v7, %v364_v7  ;;  %v1712_v24 = vpack.c.bf16 %v365_v12, %v365_v12  ;;  %v1713_v25 = vpack.c.bf16 %v366_v13, %v366_v13  ;;  %v427_v6 = vld [vmem:[%s1927_s14 + $0x4] sm:$0x1]  ;;  %v430_v13 = vld [vmem:[%s1927_s14 + $0x34] sm:$0x1] }
  0x22   : > { %v210_v26 = vsel %vm209_vm4, %v208_v10, %v207_v22  ;;  %v399_v27 = vunpack.c.l.b16 %v1706_v16  ;;  %v400_v28 = vunpack.c.l.b16 %v1707_v17  ;;  %v401_v29 = vunpack.c.l.b16 %v1708_v19  ;;  %v429_v12 = vld [vmem:[%s1927_s14 + $0x24] sm:$0x1]  ;;  %v432_v19 = vld [vmem:[%s1927_s14 + $0x54] sm:$0x1] }
  0x23   : > { %v213_v31 = vsel %vm212_vm5, %v211_v11, %v210_v26  ;;  %v402_v32 = vunpack.c.l.b16 %v1709_v20  ;;  %v403_v33 = vunpack.c.l.b16 %v1710_v21  ;;  %v404_v34 = vunpack.c.l.b16 %v1711_v23  ;;  %v428_v11 = vld [vmem:[%s1927_s14 + $0x14] sm:$0x1]  ;;  %v431_v18 = vld [vmem:[%s1927_s14 + $0x44] sm:$0x1] }
  0x24   : > { %v216_v38 = vsel %vm215_vm6, %v214_v15, %v213_v31  ;;  %v405_v39 = vunpack.c.l.b16 %v1712_v24  ;;  %v406_v40 = vunpack.c.l.b16 %v1713_v25  ;;  %v407_v41 = vrot.slane %v400_v28, 7  ;;  %v433_v24 = vld [vmem:[%s1927_s14 + $0x64] sm:$0x1]  ;;  %v434_v28 = vld [vmem:[%s1927_s14 + $0x74] sm:$0x1] }
  0x25   : > { %v217_v44 = vpack.c.b16 %v216_v38, %v216_v38  ;;  %v409_v45 = vrot.slane %v401_v29, 6  ;;  %v411_v46 = vrot.slane %v402_v32, 5  ;;  %v413_v47 = vrot.slane %v403_v33, 4 }
  0x26   : > { %v408_v49 = vsel %vm197_vm0, %v407_v41, %v399_v27  ;;  %v415_v50 = vrot.slane %v404_v34, 3  ;;  %v417_v51 = vrot.slane %v405_v39, 2  ;;  %v419_v52 = vrot.slane %v406_v40, 1 }
  0x27   : > { %218 = vrot.lane.b32.xlu0 %v217_v44, %s1875_s16  ;;  %v410_v54 = vsel %vm200_vm1, %v409_v45, %v408_v49  ;;  %v1690_v55 = vpack.c.bf16 %v223_v30, %v223_v30  ;;  %v1691_v56 = vpack.c.bf16 %v224_v35, %v224_v35  ;;  %v1692_v57 = vpack.c.bf16 %v225_v36, %v225_v36 }
  0x28   : > { %v412_v58 = vsel %vm203_vm2, %v411_v46, %v410_v54  ;;  %v1693_v59 = vpack.c.bf16 %v226_v37, %v226_v37  ;;  %v1694_v60 = vpack.c.bf16 %v227_v42, %v227_v42  ;;  %v1695_v61 = vpack.c.bf16 %v228_v43, %v228_v43  ;;  %v563_v46 = vld [vmem:[%s1927_s14 + $0x6] sm:$0x1] }
  0x29   : > { %v414_v62 = vsel %vm206_vm3, %v413_v47, %v412_v58  ;;  %v1696_v63 = vpack.c.bf16 %v229_v48, %v229_v48  ;;  %v1697_v0 = vpack.c.bf16 %v230_v53, %v230_v53  ;;  %v263_v1 = vunpack.c.l.b16 %v1690_v55  ;;  %v564_v47 = vld [vmem:[%s1927_s14 + $0x16] sm:$0x1]  ;;  %v565_v48 = vld [vmem:[%s1927_s14 + $0x26] sm:$0x1] }
  0x2a   : > { %v416_v2 = vsel %vm209_vm4, %v415_v50, %v414_v62  ;;  %v264_v3 = vunpack.c.l.b16 %v1691_v56  ;;  %v265_v4 = vunpack.c.l.b16 %v1692_v57  ;;  %v266_v5 = vunpack.c.l.b16 %v1693_v59  ;;  %v566_v53 = vld [vmem:[%s1927_s14 + $0x36] sm:$0x1]  ;;  %v567_v54 = vld [vmem:[%s1927_s14 + $0x46] sm:$0x1] }
  0x2b   : > { %v418_v7 = vsel %vm212_vm5, %v417_v51, %v416_v2  ;;  %v267_v8 = vunpack.c.l.b16 %v1694_v60  ;;  %v268_v9 = vunpack.c.l.b16 %v1695_v61  ;;  %v269_v10 = vunpack.c.l.b16 %v1696_v63  ;;  %v568_v55 = vld [vmem:[%s1927_s14 + $0x56] sm:$0x1]  ;;  %v569_v60 = vld [vmem:[%s1927_s14 + $0x66] sm:$0x1] }
  0x2c   : > { %v420_v14 = vsel %vm215_vm6, %v419_v52, %v418_v7  ;;  %v270_v15 = vunpack.c.l.b16 %v1697_v0  ;;  %v271_v16 = vrot.slane %v264_v3, 7  ;;  %v273_v17 = vrot.slane %v265_v4, 6 }
  0x2d   : > { %v421_v20 = vpack.c.b16 %v420_v14, %v420_v14  ;;  %v275_v21 = vrot.slane %v266_v5, 5  ;;  %v277_v22 = vrot.slane %v267_v8, 4  ;;  %v279_v23 = vrot.slane %v268_v9, 3 }
  0x2e   : > { %v272_v25 = vsel %vm197_vm0, %v271_v16, %v263_v1  ;;  %v281_v26 = vrot.slane %v269_v10, 2  ;;  %v283_v27 = vrot.slane %v270_v15, 1  ;;  %v1714_v29 = vpack.c.bf16 %v427_v6, %v427_v6  ;;  %v570_v1 = vld [vmem:[%s1927_s14 + $0x76] sm:$0x1] }
  0x2f   : > { %422 = vrot.lane.b32.xlu1 %v421_v20, %s1876_s17  ;;  %v274_v30 = vsel %vm200_vm1, %v273_v17, %v272_v25  ;;  %v1715_v31 = vpack.c.bf16 %v428_v11, %v428_v11  ;;  %v1716_v32 = vpack.c.bf16 %v429_v12, %v429_v12  ;;  %v1717_v33 = vpack.c.bf16 %v430_v13, %v430_v13 }
  0x30   : > { %v276_v34 = vsel %vm203_vm2, %v275_v21, %v274_v30  ;;  %v1718_v35 = vpack.c.bf16 %v431_v18, %v431_v18  ;;  %v1719_v36 = vpack.c.bf16 %v432_v19, %v432_v19  ;;  %v1720_v37 = vpack.c.bf16 %v433_v24, %v433_v24  ;;  %v638_v24 = vld [vmem:[%s1927_s14 + $0x27] sm:$0x1] }
  0x31   : > { %v278_v38 = vsel %vm206_vm3, %v277_v22, %v276_v34  ;;  %v1721_v39 = vpack.c.bf16 %v434_v28, %v434_v28  ;;  %v467_v40 = vunpack.c.l.b16 %v1714_v29  ;;  %v468_v41 = vunpack.c.l.b16 %v1715_v31  ;;  %v636_v22 = vld [vmem:[%s1927_s14 + $0x7] sm:$0x1]  ;;  %v639_v29 = vld [vmem:[%s1927_s14 + $0x37] sm:$0x1] }
  0x32   : > { %v280_v42 = vsel %vm209_vm4, %v279_v23, %v278_v38  ;;  %v469_v43 = vunpack.c.l.b16 %v1716_v32  ;;  %v470_v44 = vunpack.c.l.b16 %v1717_v33  ;;  %v471_v45 = vunpack.c.l.b16 %v1718_v35  ;;  %v637_v23 = vld [vmem:[%s1927_s14 + $0x17] sm:$0x1]  ;;  %v640_v30 = vld [vmem:[%s1927_s14 + $0x47] sm:$0x1] }
  0x33   : > { %v282_v49 = vsel %vm212_vm5, %v281_v26, %v280_v42  ;;  %v472_v50 = vunpack.c.l.b16 %v1719_v36  ;;  %v473_v51 = vunpack.c.l.b16 %v1720_v37  ;;  %v474_v52 = vunpack.c.l.b16 %v1721_v39  ;;  %v641_v35 = vld [vmem:[%s1927_s14 + $0x57] sm:$0x1] }
  0x34   : > { %v284_v56 = vsel %vm215_vm6, %v283_v27, %v282_v49  ;;  %v475_v57 = vrot.slane %v468_v41, 7  ;;  %v477_v58 = vrot.slane %v469_v43, 6  ;;  %v479_v59 = vrot.slane %v470_v44, 5  ;;  %v643_v41 = vld [vmem:[%s1927_s14 + $0x77] sm:$0x1] }
  0x35   : > { %v285_v61 = vpack.c.b16 %v284_v56, %v284_v56  ;;  %v481_v62 = vrot.slane %v471_v45, 4  ;;  %v483_v63 = vrot.slane %v472_v50, 3  ;;  %v485_v0 = vrot.slane %v473_v51, 2 }
  0x36   : > { %v476_v2 = vsel %vm197_vm0, %v475_v57, %v467_v40  ;;  %v487_v3 = vrot.slane %v474_v52, 1  ;;  %v1730_v4 = vpack.c.bf16 %v563_v46, %v563_v46  ;;  %v1731_v5 = vpack.c.bf16 %v564_v47, %v564_v47  ;;  %v642_v40 = vld [vmem:[%s1927_s14 + $0x67] sm:$0x1] }
  0x37   : > { %286 = vrot.lane.b32.xlu0 %v285_v61, %s1877_s18  ;;  %v478_v6 = vsel %vm200_vm1, %v477_v58, %v476_v2  ;;  %v1732_v7 = vpack.c.bf16 %v565_v48, %v565_v48  ;;  %v1733_v8 = vpack.c.bf16 %v566_v53, %v566_v53  ;;  %v1734_v9 = vpack.c.bf16 %v567_v54, %v567_v54  ;;  %v495_v58 = vld [vmem:[%s1927_s14 + $0x5] sm:$0x1] }
  0x38   : > { %v480_v10 = vsel %vm203_vm2, %v479_v59, %v478_v6  ;;  %v1735_v11 = vpack.c.bf16 %v568_v55, %v568_v55  ;;  %v1736_v12 = vpack.c.bf16 %v569_v60, %v569_v60  ;;  %v1737_v13 = vpack.c.bf16 %v570_v1, %v570_v1  ;;  %v498_v1 = vld [vmem:[%s1927_s14 + $0x35] sm:$0x1]  ;;  %v499_v6 = vld [vmem:[%s1927_s14 + $0x45] sm:$0x1] }
  0x39   : > { %v482_v14 = vsel %vm206_vm3, %v481_v62, %v480_v10  ;;  %v603_v15 = vunpack.c.l.b16 %v1730_v4  ;;  %v604_v16 = vunpack.c.l.b16 %v1731_v5  ;;  %v605_v17 = vunpack.c.l.b16 %v1732_v7  ;;  %v500_v7 = vld [vmem:[%s1927_s14 + $0x55] sm:$0x1] }
  0x3a   : > { %v484_v18 = vsel %vm209_vm4, %v483_v63, %v482_v14  ;;  %v606_v19 = vunpack.c.l.b16 %v1733_v8  ;;  %v607_v20 = vunpack.c.l.b16 %v1734_v9  ;;  %v608_v21 = vunpack.c.l.b16 %v1735_v11  ;;  %v496_v63 = vld [vmem:[%s1927_s14 + $0x15] sm:$0x1] }
  0x3b   : > { %v486_v25 = vsel %vm212_vm5, %v485_v0, %v484_v18  ;;  %v609_v26 = vunpack.c.l.b16 %v1736_v12  ;;  %v610_v27 = vunpack.c.l.b16 %v1737_v13  ;;  %v611_v28 = vrot.slane %v604_v16, 7  ;;  %v497_v0 = vld [vmem:[%s1927_s14 + $0x25] sm:$0x1] }
  0x3c   : > { %v488_v31 = vsel %vm215_vm6, %v487_v3, %v486_v25  ;;  %v613_v32 = vrot.slane %v605_v17, 6  ;;  %v615_v33 = vrot.slane %v606_v19, 5  ;;  %v617_v34 = vrot.slane %v607_v20, 4  ;;  %v501_v12 = vld [vmem:[%s1927_s14 + $0x65] sm:$0x1] }
  0x3d   : > { %v489_v36 = vpack.c.b16 %v488_v31, %v488_v31  ;;  %v612_v37 = vsel %vm197_vm0, %v611_v28, %v603_v15  ;;  %v619_v38 = vrot.slane %v608_v21, 3  ;;  %v621_v39 = vrot.slane %v609_v26, 2  ;;  %v502_v17 = vld [vmem:[%s1927_s14 + $0x75] sm:$0x1] }
  0x3e   : > { %v614_v42 = vsel %vm200_vm1, %v613_v32, %v612_v37  ;;  %v623_v43 = vrot.slane %v610_v27, 1  ;;  %v1738_v44 = vpack.c.bf16 %v636_v22, %v636_v22  ;;  %v1739_v45 = vpack.c.bf16 %v637_v23, %v637_v23 }
  0x3f   : > { %490 = vrot.lane.b32.xlu1 %v489_v36, %s1878_s19  ;;  %v616_v46 = vsel %vm203_vm2, %v615_v33, %v614_v42  ;;  %v1740_v47 = vpack.c.bf16 %v638_v24, %v638_v24  ;;  %v1741_v48 = vpack.c.bf16 %v639_v29, %v639_v29  ;;  %v1742_v49 = vpack.c.bf16 %v640_v30, %v640_v30 }
  0x40   : > { %v618_v50 = vsel %vm206_vm3, %v617_v34, %v616_v46  ;;  %v1743_v51 = vpack.c.bf16 %v641_v35, %v641_v35  ;;  %v1744_v52 = vpack.c.bf16 %v642_v40, %v642_v40  ;;  %v1745_v53 = vpack.c.bf16 %v643_v41, %v643_v41  ;;  %v772_v34 = vld [vmem:[%s1927_s14 + $0x9] sm:$0x1]  ;;  %v775_v41 = vld [vmem:[%s1927_s14 + $0x39] sm:$0x1] }
  0x41   : > { %v620_v54 = vsel %vm209_vm4, %v619_v38, %v618_v50  ;;  %v676_v55 = vunpack.c.l.b16 %v1738_v44  ;;  %v677_v56 = vunpack.c.l.b16 %v1739_v45  ;;  %v678_v57 = vunpack.c.l.b16 %v1740_v47  ;;  %v774_v40 = vld [vmem:[%s1927_s14 + $0x29] sm:$0x1]  ;;  %v777_v47 = vld [vmem:[%s1927_s14 + $0x59] sm:$0x1] }
  0x42   : > { %v622_v59 = vsel %vm212_vm5, %v621_v39, %v620_v54  ;;  %v679_v60 = vunpack.c.l.b16 %v1741_v48  ;;  %v680_v61 = vunpack.c.l.b16 %v1742_v49  ;;  %v681_v62 = vunpack.c.l.b16 %v1743_v51  ;;  %v773_v39 = vld [vmem:[%s1927_s14 + $0x19] sm:$0x1]  ;;  %v776_v46 = vld [vmem:[%s1927_s14 + $0x49] sm:$0x1] }
  0x43   : > { %v624_v2 = vsel %vm215_vm6, %v623_v43, %v622_v59  ;;  %v682_v3 = vunpack.c.l.b16 %v1744_v52  ;;  %v683_v4 = vunpack.c.l.b16 %v1745_v53  ;;  %v684_v5 = vrot.slane %v677_v56, 7  ;;  %v778_v52 = vld [vmem:[%s1927_s14 + $0x69] sm:$0x1]  ;;  %v779_v56 = vld [vmem:[%s1927_s14 + $0x79] sm:$0x1] }
  0x44   : > { %v625_v8 = vpack.c.b16 %v624_v2, %v624_v2  ;;  %v686_v9 = vrot.slane %v678_v57, 6  ;;  %v688_v10 = vrot.slane %v679_v60, 5  ;;  %v690_v11 = vrot.slane %v680_v61, 4 }
  0x45   : > { %v685_v13 = vsel %vm197_vm0, %v684_v5, %v676_v55  ;;  %v692_v14 = vrot.slane %v681_v62, 3  ;;  %v694_v15 = vrot.slane %v682_v3, 2  ;;  %v696_v16 = vrot.slane %v683_v4, 1 }
  0x46   : > { %626 = vrot.lane.b32.xlu0 %v625_v8, %s1879_s20  ;;  %v687_v18 = vsel %vm200_vm1, %v686_v9, %v685_v13  ;;  %v1722_v19 = vpack.c.bf16 %v495_v58, %v495_v58  ;;  %v1723_v20 = vpack.c.bf16 %v496_v63, %v496_v63  ;;  %v1724_v21 = vpack.c.bf16 %v497_v0, %v497_v0 }
  0x47   : > { %v689_v22 = vsel %vm203_vm2, %v688_v10, %v687_v18  ;;  %v1725_v23 = vpack.c.bf16 %v498_v1, %v498_v1  ;;  %v1726_v24 = vpack.c.bf16 %v499_v6, %v499_v6  ;;  %v1727_v25 = vpack.c.bf16 %v500_v7, %v500_v7  ;;  %v704_v10 = vld [vmem:[%s1927_s14 + $0x8] sm:$0x1] }
  0x48   : > { %v691_v26 = vsel %vm206_vm3, %v690_v11, %v689_v22  ;;  %v1728_v27 = vpack.c.bf16 %v501_v12, %v501_v12  ;;  %v1729_v28 = vpack.c.bf16 %v502_v17, %v502_v17  ;;  %v535_v29 = vunpack.c.l.b16 %v1722_v19  ;;  %v705_v11 = vld [vmem:[%s1927_s14 + $0x18] sm:$0x1]  ;;  %v706_v12 = vld [vmem:[%s1927_s14 + $0x28] sm:$0x1] }
  0x49   : > { %v693_v30 = vsel %vm209_vm4, %v692_v14, %v691_v26  ;;  %v536_v31 = vunpack.c.l.b16 %v1723_v20  ;;  %v537_v32 = vunpack.c.l.b16 %v1724_v21  ;;  %v538_v33 = vunpack.c.l.b16 %v1725_v23  ;;  %v707_v17 = vld [vmem:[%s1927_s14 + $0x38] sm:$0x1]  ;;  %v708_v18 = vld [vmem:[%s1927_s14 + $0x48] sm:$0x1] }
  0x4a   : > { %v695_v35 = vsel %vm212_vm5, %v694_v15, %v693_v30  ;;  %v539_v36 = vunpack.c.l.b16 %v1726_v24  ;;  %v540_v37 = vunpack.c.l.b16 %v1727_v25  ;;  %v541_v38 = vunpack.c.l.b16 %v1728_v27  ;;  %v709_v19 = vld [vmem:[%s1927_s14 + $0x58] sm:$0x1]  ;;  %v710_v24 = vld [vmem:[%s1927_s14 + $0x68] sm:$0x1] }
  0x4b   : > { %v697_v42 = vsel %vm215_vm6, %v696_v16, %v695_v35  ;;  %v542_v43 = vunpack.c.l.b16 %v1729_v28  ;;  %v543_v44 = vrot.slane %v536_v31, 7  ;;  %v545_v45 = vrot.slane %v537_v32, 6 }
  0x4c   : > { %v698_v48 = vpack.c.b16 %v697_v42, %v697_v42  ;;  %v547_v49 = vrot.slane %v538_v33, 5  ;;  %v549_v50 = vrot.slane %v539_v36, 4  ;;  %v551_v51 = vrot.slane %v540_v37, 3 }
  0x4d   : > { %v544_v53 = vsel %vm197_vm0, %v543_v44, %v535_v29  ;;  %v553_v54 = vrot.slane %v541_v38, 2  ;;  %v555_v55 = vrot.slane %v542_v43, 1  ;;  %v1754_v57 = vpack.c.bf16 %v772_v34, %v772_v34  ;;  %v711_v29 = vld [vmem:[%s1927_s14 + $0x78] sm:$0x1] }
  0x4e   : > { %699 = vrot.lane.b32.xlu1 %v698_v48, %s1880_s21  ;;  %v546_v58 = vsel %vm200_vm1, %v545_v45, %v544_v53  ;;  %v1755_v59 = vpack.c.bf16 %v773_v39, %v773_v39  ;;  %v1756_v60 = vpack.c.bf16 %v774_v40, %v774_v40  ;;  %v1757_v61 = vpack.c.bf16 %v775_v41, %v775_v41 }
  0x4f   : > { %v548_v62 = vsel %vm203_vm2, %v547_v49, %v546_v58  ;;  %v1758_v63 = vpack.c.bf16 %v776_v46, %v776_v46  ;;  %v1759_v0 = vpack.c.bf16 %v777_v47, %v777_v47  ;;  %v1760_v1 = vpack.c.bf16 %v778_v52, %v778_v52  ;;  %v1046_v52 = vld [vmem:[%s1927_s14 + $0x2d] sm:$0x1] }
  0x50   : > { %v550_v2 = vsel %vm206_vm3, %v549_v50, %v548_v62  ;;  %v1761_v3 = vpack.c.bf16 %v779_v56, %v779_v56  ;;  %v812_v4 = vunpack.c.l.b16 %v1754_v57  ;;  %v813_v5 = vunpack.c.l.b16 %v1755_v59  ;;  %v1044_v50 = vld [vmem:[%s1927_s14 + $0xd] sm:$0x1]  ;;  %v1047_v57 = vld [vmem:[%s1927_s14 + $0x3d] sm:$0x1] }
  0x51   : > { %v552_v6 = vsel %vm209_vm4, %v551_v51, %v550_v2  ;;  %v814_v7 = vunpack.c.l.b16 %v1756_v60  ;;  %v815_v8 = vunpack.c.l.b16 %v1757_v61  ;;  %v816_v9 = vunpack.c.l.b16 %v1758_v63  ;;  %v1045_v51 = vld [vmem:[%s1927_s14 + $0x1d] sm:$0x1]  ;;  %v1048_v58 = vld [vmem:[%s1927_s14 + $0x4d] sm:$0x1] }
  0x52   : > { %v554_v13 = vsel %vm212_vm5, %v553_v54, %v552_v6  ;;  %v817_v14 = vunpack.c.l.b16 %v1759_v0  ;;  %v818_v15 = vunpack.c.l.b16 %v1760_v1  ;;  %v819_v16 = vunpack.c.l.b16 %v1761_v3  ;;  %v1049_v63 = vld [vmem:[%s1927_s14 + $0x5d] sm:$0x1] }
  0x53   : > { %v556_v20 = vsel %vm215_vm6, %v555_v55, %v554_v13  ;;  %v820_v21 = vrot.slane %v813_v5, 7  ;;  %v822_v22 = vrot.slane %v814_v7, 6  ;;  %v824_v23 = vrot.slane %v815_v8, 5  ;;  %v1051_v5 = vld [vmem:[%s1927_s14 + $0x7d] sm:$0x1] }
  0x54   : > { %v557_v25 = vpack.c.b16 %v556_v20, %v556_v20  ;;  %v826_v26 = vrot.slane %v816_v9, 4  ;;  %v828_v27 = vrot.slane %v817_v14, 3  ;;  %v830_v28 = vrot.slane %v818_v15, 2 }
  0x55   : > { %v821_v30 = vsel %vm197_vm0, %v820_v21, %v812_v4  ;;  %v832_v31 = vrot.slane %v819_v16, 1  ;;  %v1746_v32 = vpack.c.bf16 %v704_v10, %v704_v10  ;;  %v1747_v33 = vpack.c.bf16 %v705_v11, %v705_v11  ;;  %v1050_v4 = vld [vmem:[%s1927_s14 + $0x6d] sm:$0x1] }
  0x56   : > { %558 = vrot.lane.b32.xlu0 %v557_v25, %s1881_s22  ;;  %v823_v34 = vsel %vm200_vm1, %v822_v22, %v821_v30  ;;  %v1748_v35 = vpack.c.bf16 %v706_v12, %v706_v12  ;;  %v1749_v36 = vpack.c.bf16 %v707_v17, %v707_v17  ;;  %v1750_v37 = vpack.c.bf16 %v708_v18, %v708_v18  ;;  %v840_v22 = vld [vmem:[%s1927_s14 + $0xa] sm:$0x1] }
  0x57   : > { %v825_v38 = vsel %vm203_vm2, %v824_v23, %v823_v34  ;;  %v1751_v39 = vpack.c.bf16 %v709_v19, %v709_v19  ;;  %v1752_v40 = vpack.c.bf16 %v710_v24, %v710_v24  ;;  %v1753_v41 = vpack.c.bf16 %v711_v29, %v711_v29  ;;  %v843_v29 = vld [vmem:[%s1927_s14 + $0x3a] sm:$0x1]  ;;  %v844_v34 = vld [vmem:[%s1927_s14 + $0x4a] sm:$0x1] }
  0x58   : > { %v827_v42 = vsel %vm206_vm3, %v826_v26, %v825_v38  ;;  %v744_v43 = vunpack.c.l.b16 %v1746_v32  ;;  %v745_v44 = vunpack.c.l.b16 %v1747_v33  ;;  %v746_v45 = vunpack.c.l.b16 %v1748_v35  ;;  %v845_v35 = vld [vmem:[%s1927_s14 + $0x5a] sm:$0x1] }
  0x59   : > { %v829_v46 = vsel %vm209_vm4, %v828_v27, %v827_v42  ;;  %v747_v47 = vunpack.c.l.b16 %v1749_v36  ;;  %v748_v48 = vunpack.c.l.b16 %v1750_v37  ;;  %v749_v49 = vunpack.c.l.b16 %v1751_v39  ;;  %v841_v27 = vld [vmem:[%s1927_s14 + $0x1a] sm:$0x1] }
  0x5a   : > { %v831_v53 = vsel %vm212_vm5, %v830_v28, %v829_v46  ;;  %v750_v54 = vunpack.c.l.b16 %v1752_v40  ;;  %v751_v55 = vunpack.c.l.b16 %v1753_v41  ;;  %v752_v56 = vrot.slane %v745_v44, 7  ;;  %v842_v28 = vld [vmem:[%s1927_s14 + $0x2a] sm:$0x1] }
  0x5b   : > { %v833_v59 = vsel %vm215_vm6, %v832_v31, %v831_v53  ;;  %v754_v60 = vrot.slane %v746_v45, 6  ;;  %v756_v61 = vrot.slane %v747_v47, 5  ;;  %v758_v62 = vrot.slane %v748_v48, 4  ;;  %v846_v40 = vld [vmem:[%s1927_s14 + $0x6a] sm:$0x1] }
  0x5c   : > { %v834_v0 = vpack.c.b16 %v833_v59, %v833_v59  ;;  %v753_v1 = vsel %vm197_vm0, %v752_v56, %v744_v43  ;;  %v760_v2 = vrot.slane %v749_v49, 3  ;;  %v762_v3 = vrot.slane %v750_v54, 2  ;;  %v847_v45 = vld [vmem:[%s1927_s14 + $0x7a] sm:$0x1] }
  0x5d   : > { %v755_v6 = vsel %vm200_vm1, %v754_v60, %v753_v1  ;;  %v764_v7 = vrot.slane %v751_v55, 1  ;;  %v1786_v8 = vpack.c.bf16 %v1044_v50, %v1044_v50  ;;  %v1787_v9 = vpack.c.bf16 %v1045_v51, %v1045_v51 }
  0x5e   : > { %835 = vrot.lane.b32.xlu1 %v834_v0, %s1882_s23  ;;  %v757_v10 = vsel %vm203_vm2, %v756_v61, %v755_v6  ;;  %v1788_v11 = vpack.c.bf16 %v1046_v52, %v1046_v52  ;;  %v1789_v12 = vpack.c.bf16 %v1047_v57, %v1047_v57  ;;  %v1790_v13 = vpack.c.bf16 %v1048_v58, %v1048_v58 }
  0x5f   : > { %v759_v14 = vsel %vm206_vm3, %v758_v62, %v757_v10  ;;  %v1791_v15 = vpack.c.bf16 %v1049_v63, %v1049_v63  ;;  %v1792_v16 = vpack.c.bf16 %v1050_v4, %v1050_v4  ;;  %v1793_v17 = vpack.c.bf16 %v1051_v5, %v1051_v5  ;;  %v908_v62 = vld [vmem:[%s1927_s14 + $0xb] sm:$0x1]  ;;  %v911_v5 = vld [vmem:[%s1927_s14 + $0x3b] sm:$0x1] }
  0x60   : > { %v761_v18 = vsel %vm209_vm4, %v760_v2, %v759_v14  ;;  %v1084_v19 = vunpack.c.l.b16 %v1786_v8  ;;  %v1085_v20 = vunpack.c.l.b16 %v1787_v9  ;;  %v1086_v21 = vunpack.c.l.b16 %v1788_v11  ;;  %v910_v4 = vld [vmem:[%s1927_s14 + $0x2b] sm:$0x1]  ;;  %v913_v11 = vld [vmem:[%s1927_s14 + $0x5b] sm:$0x1] }
  0x61   : > { %v763_v23 = vsel %vm212_vm5, %v762_v3, %v761_v18  ;;  %v1087_v24 = vunpack.c.l.b16 %v1789_v12  ;;  %v1088_v25 = vunpack.c.l.b16 %v1790_v13  ;;  %v1089_v26 = vunpack.c.l.b16 %v1791_v15  ;;  %v909_v3 = vld [vmem:[%s1927_s14 + $0x1b] sm:$0x1]  ;;  %v912_v10 = vld [vmem:[%s1927_s14 + $0x4b] sm:$0x1] }
  0x62   : > { %v765_v30 = vsel %vm215_vm6, %v764_v7, %v763_v23  ;;  %v1090_v31 = vunpack.c.l.b16 %v1792_v16  ;;  %v1091_v32 = vunpack.c.l.b16 %v1793_v17  ;;  %v1092_v33 = vrot.slane %v1085_v20, 7  ;;  %v914_v16 = vld [vmem:[%s1927_s14 + $0x6b] sm:$0x1]  ;;  %v915_v20 = vld [vmem:[%s1927_s14 + $0x7b] sm:$0x1] }
  0x63   : > { %v766_v36 = vpack.c.b16 %v765_v30, %v765_v30  ;;  %v1094_v37 = vrot.slane %v1086_v21, 6  ;;  %v1096_v38 = vrot.slane %v1087_v24, 5  ;;  %v1098_v39 = vrot.slane %v1088_v25, 4 }
  0x64   : > { %v1093_v41 = vsel %vm197_vm0, %v1092_v33, %v1084_v19  ;;  %v1100_v42 = vrot.slane %v1089_v26, 3  ;;  %v1102_v43 = vrot.slane %v1090_v31, 2  ;;  %v1104_v44 = vrot.slane %v1091_v32, 1 }
  0x65   : > { %767 = vrot.lane.b32.xlu0 %v766_v36, %s1883_s24  ;;  %v1095_v46 = vsel %vm200_vm1, %v1094_v37, %v1093_v41  ;;  %v1762_v47 = vpack.c.bf16 %v840_v22, %v840_v22  ;;  %v1763_v48 = vpack.c.bf16 %v841_v27, %v841_v27  ;;  %v1764_v49 = vpack.c.bf16 %v842_v28, %v842_v28 }
  0x66   : > { %v1097_v50 = vsel %vm203_vm2, %v1096_v38, %v1095_v46  ;;  %v1765_v51 = vpack.c.bf16 %v843_v29, %v843_v29  ;;  %v1766_v52 = vpack.c.bf16 %v844_v34, %v844_v34  ;;  %v1767_v53 = vpack.c.bf16 %v845_v35, %v845_v35  ;;  %v976_v38 = vld [vmem:[%s1927_s14 + $0xc] sm:$0x1] }
  0x67   : > { %v1099_v54 = vsel %vm206_vm3, %v1098_v39, %v1097_v50  ;;  %v1768_v55 = vpack.c.bf16 %v846_v40, %v846_v40  ;;  %v1769_v56 = vpack.c.bf16 %v847_v45, %v847_v45  ;;  %v880_v57 = vunpack.c.l.b16 %v1762_v47  ;;  %v977_v39 = vld [vmem:[%s1927_s14 + $0x1c] sm:$0x1]  ;;  %v978_v40 = vld [vmem:[%s1927_s14 + $0x2c] sm:$0x1] }
  0x68   : > { %v1101_v58 = vsel %vm209_vm4, %v1100_v42, %v1099_v54  ;;  %v881_v59 = vunpack.c.l.b16 %v1763_v48  ;;  %v882_v60 = vunpack.c.l.b16 %v1764_v49  ;;  %v883_v61 = vunpack.c.l.b16 %v1765_v51  ;;  %v979_v45 = vld [vmem:[%s1927_s14 + $0x3c] sm:$0x1]  ;;  %v980_v46 = vld [vmem:[%s1927_s14 + $0x4c] sm:$0x1] }
  0x69   : > { %v1103_v63 = vsel %vm212_vm5, %v1102_v43, %v1101_v58  ;;  %v884_v0 = vunpack.c.l.b16 %v1766_v52  ;;  %v885_v1 = vunpack.c.l.b16 %v1767_v53  ;;  %v886_v2 = vunpack.c.l.b16 %v1768_v55  ;;  %v981_v47 = vld [vmem:[%s1927_s14 + $0x5c] sm:$0x1]  ;;  %v982_v52 = vld [vmem:[%s1927_s14 + $0x6c] sm:$0x1] }
  0x6a   : > { %v1105_v6 = vsel %vm215_vm6, %v1104_v44, %v1103_v63  ;;  %v887_v7 = vunpack.c.l.b16 %v1769_v56  ;;  %v888_v8 = vrot.slane %v881_v59, 7  ;;  %v890_v9 = vrot.slane %v882_v60, 6 }
  0x6b   : > { %v1106_v12 = vpack.c.b16 %v1105_v6, %v1105_v6  ;;  %v892_v13 = vrot.slane %v883_v61, 5  ;;  %v894_v14 = vrot.slane %v884_v0, 4  ;;  %v896_v15 = vrot.slane %v885_v1, 3 }
  0x6c   : > { %v889_v17 = vsel %vm197_vm0, %v888_v8, %v880_v57  ;;  %v898_v18 = vrot.slane %v886_v2, 2  ;;  %v900_v19 = vrot.slane %v887_v7, 1  ;;  %v1770_v21 = vpack.c.bf16 %v908_v62, %v908_v62  ;;  %v983_v57 = vld [vmem:[%s1927_s14 + $0x7c] sm:$0x1] }
  0x6d   : > { %1107 = vrot.lane.b32.xlu1 %v1106_v12, %s1884_s25  ;;  %v891_v22 = vsel %vm200_vm1, %v890_v9, %v889_v17  ;;  %v1771_v23 = vpack.c.bf16 %v909_v3, %v909_v3  ;;  %v1772_v24 = vpack.c.bf16 %v910_v4, %v910_v4  ;;  %v1773_v25 = vpack.c.bf16 %v911_v5, %v911_v5 }
  0x6e   : > { %v893_v26 = vsel %vm203_vm2, %v892_v13, %v891_v22  ;;  %v1774_v27 = vpack.c.bf16 %v912_v10, %v912_v10  ;;  %v1775_v28 = vpack.c.bf16 %v913_v11, %v913_v11  ;;  %v1776_v29 = vpack.c.bf16 %v914_v16, %v914_v16  ;;  %v1119_v16 = vld [vmem:[%s1927_s14 + $0x2e] sm:$0x1] }
  0x6f   : > { %v895_v30 = vsel %vm206_vm3, %v894_v14, %v893_v26  ;;  %v1777_v31 = vpack.c.bf16 %v915_v20, %v915_v20  ;;  %v948_v32 = vunpack.c.l.b16 %v1770_v21  ;;  %v949_v33 = vunpack.c.l.b16 %v1771_v23  ;;  %v1117_v14 = vld [vmem:[%s1927_s14 + $0xe] sm:$0x1]  ;;  %v1120_v21 = vld [vmem:[%s1927_s14 + $0x3e] sm:$0x1] }
  0x70   : > { %v897_v34 = vsel %vm209_vm4, %v896_v15, %v895_v30  ;;  %v950_v35 = vunpack.c.l.b16 %v1772_v24  ;;  %v951_v36 = vunpack.c.l.b16 %v1773_v25  ;;  %v952_v37 = vunpack.c.l.b16 %v1774_v27  ;;  %v1118_v15 = vld [vmem:[%s1927_s14 + $0x1e] sm:$0x1]  ;;  %v1121_v22 = vld [vmem:[%s1927_s14 + $0x4e] sm:$0x1] }
  0x71   : > { %v899_v41 = vsel %vm212_vm5, %v898_v18, %v897_v34  ;;  %v953_v42 = vunpack.c.l.b16 %v1775_v28  ;;  %v954_v43 = vunpack.c.l.b16 %v1776_v29  ;;  %v955_v44 = vunpack.c.l.b16 %v1777_v31  ;;  %v1122_v27 = vld [vmem:[%s1927_s14 + $0x5e] sm:$0x1] }
  0x72   : > { %v901_v48 = vsel %vm215_vm6, %v900_v19, %v899_v41  ;;  %v956_v49 = vrot.slane %v949_v33, 7  ;;  %v958_v50 = vrot.slane %v950_v35, 6  ;;  %v960_v51 = vrot.slane %v951_v36, 5  ;;  %v1124_v33 = vld [vmem:[%s1927_s14 + $0x7e] sm:$0x1] }
  0x73   : > { %v902_v53 = vpack.c.b16 %v901_v48, %v901_v48  ;;  %v962_v54 = vrot.slane %v952_v37, 4  ;;  %v964_v55 = vrot.slane %v953_v42, 3  ;;  %v966_v56 = vrot.slane %v954_v43, 2 }
  0x74   : > { %v957_v58 = vsel %vm197_vm0, %v956_v49, %v948_v32  ;;  %v968_v59 = vrot.slane %v955_v44, 1  ;;  %v1778_v60 = vpack.c.bf16 %v976_v38, %v976_v38  ;;  %v1779_v61 = vpack.c.bf16 %v977_v39, %v977_v39  ;;  %v1123_v32 = vld [vmem:[%s1927_s14 + $0x6e] sm:$0x1] }
  0x75   : > { %903 = vrot.lane.b32.xlu0 %v902_v53, %s1885_s26  ;;  %v959_v62 = vsel %vm200_vm1, %v958_v50, %v957_v58  ;;  %v1780_v63 = vpack.c.bf16 %v978_v40, %v978_v40  ;;  %v1781_v0 = vpack.c.bf16 %v979_v45, %v979_v45  ;;  %v1782_v1 = vpack.c.bf16 %v980_v46, %v980_v46  ;;  %v1185_v50 = vld [vmem:[%s1927_s14 + $0xf] sm:$0x1] }
  0x76   : > { %v961_v2 = vsel %vm203_vm2, %v960_v51, %v959_v62  ;;  %v1783_v3 = vpack.c.bf16 %v981_v47, %v981_v47  ;;  %v1784_v4 = vpack.c.bf16 %v982_v52, %v982_v52  ;;  %v1785_v5 = vpack.c.bf16 %v983_v57, %v983_v57  ;;  %v1188_v57 = vld [vmem:[%s1927_s14 + $0x3f] sm:$0x1]  ;;  %v1189_v62 = vld [vmem:[%s1927_s14 + $0x4f] sm:$0x1] }
  0x77   : > { %v963_v6 = vsel %vm206_vm3, %v962_v54, %v961_v2  ;;  %v1016_v7 = vunpack.c.l.b16 %v1778_v60  ;;  %v1017_v8 = vunpack.c.l.b16 %v1779_v61  ;;  %v1018_v9 = vunpack.c.l.b16 %v1780_v63  ;;  %v1190_v63 = vld [vmem:[%s1927_s14 + $0x5f] sm:$0x1] }
  0x78   : > { %v965_v10 = vsel %vm209_vm4, %v964_v55, %v963_v6  ;;  %v1019_v11 = vunpack.c.l.b16 %v1781_v0  ;;  %v1020_v12 = vunpack.c.l.b16 %v1782_v1  ;;  %v1021_v13 = vunpack.c.l.b16 %v1783_v3  ;;  %v1186_v55 = vld [vmem:[%s1927_s14 + $0x1f] sm:$0x1] }
  0x79   : > { %v967_v17 = vsel %vm212_vm5, %v966_v56, %v965_v10  ;;  %v1022_v18 = vunpack.c.l.b16 %v1784_v4  ;;  %v1023_v19 = vunpack.c.l.b16 %v1785_v5  ;;  %v1024_v20 = vrot.slane %v1017_v8, 7  ;;  %v1187_v56 = vld [vmem:[%s1927_s14 + $0x2f] sm:$0x1] }
  0x7a   : > { %v969_v23 = vsel %vm215_vm6, %v968_v59, %v967_v17  ;;  %v1026_v24 = vrot.slane %v1018_v9, 6  ;;  %v1028_v25 = vrot.slane %v1019_v11, 5  ;;  %v1030_v26 = vrot.slane %v1020_v12, 4  ;;  %v1191_v4 = vld [vmem:[%s1927_s14 + $0x6f] sm:$0x1] }
  0x7b   : > { %v970_v28 = vpack.c.b16 %v969_v23, %v969_v23  ;;  %v1025_v29 = vsel %vm197_vm0, %v1024_v20, %v1016_v7  ;;  %v1032_v30 = vrot.slane %v1021_v13, 3  ;;  %v1034_v31 = vrot.slane %v1022_v18, 2  ;;  %v1192_v9 = vld [vmem:[%s1927_s14 + $0x7f] sm:$0x1] }
  0x7c   : > { %v1027_v34 = vsel %vm200_vm1, %v1026_v24, %v1025_v29  ;;  %v1036_v35 = vrot.slane %v1023_v19, 1  ;;  %v1794_v36 = vpack.c.bf16 %v1117_v14, %v1117_v14  ;;  %v1795_v37 = vpack.c.bf16 %v1118_v15, %v1118_v15 }
  0x7d   : > { %971 = vrot.lane.b32.xlu0 %v970_v28, %s1886_s27  ;;  %v1029_v38 = vsel %vm203_vm2, %v1028_v25, %v1027_v34  ;;  %v1796_v39 = vpack.c.bf16 %v1119_v16, %v1119_v16  ;;  %v1797_v40 = vpack.c.bf16 %v1120_v21, %v1120_v21  ;;  %v1798_v41 = vpack.c.bf16 %v1121_v22, %v1121_v22 }
  0x7e   : > { %v1031_v42 = vsel %vm206_vm3, %v1030_v26, %v1029_v38  ;;  %v1799_v43 = vpack.c.bf16 %v1122_v27, %v1122_v27  ;;  %v1800_v44 = vpack.c.bf16 %v1123_v32, %v1123_v32  ;;  %v1801_v45 = vpack.c.bf16 %v1124_v33, %v1124_v33 }
  0x7f   : > { %v1033_v46 = vsel %vm209_vm4, %v1032_v30, %v1031_v42  ;;  %v1157_v47 = vunpack.c.l.b16 %v1794_v36  ;;  %v1158_v48 = vunpack.c.l.b16 %v1795_v37  ;;  %v1159_v49 = vunpack.c.l.b16 %v1796_v39 }
  0x80   : > { %v1035_v51 = vsel %vm212_vm5, %v1034_v31, %v1033_v46  ;;  %v1160_v52 = vunpack.c.l.b16 %v1797_v40  ;;  %v1161_v53 = vunpack.c.l.b16 %v1798_v41  ;;  %v1162_v54 = vunpack.c.l.b16 %v1799_v43 }
  0x81   : > { %v1037_v58 = vsel %vm215_vm6, %v1036_v35, %v1035_v51  ;;  %v1163_v59 = vunpack.c.l.b16 %v1800_v44  ;;  %v1164_v60 = vunpack.c.l.b16 %v1801_v45  ;;  %v1165_v61 = vrot.slane %v1158_v48, 7 }
  0x82   : > { %v1038_v0 = vpack.c.b16 %v1037_v58, %v1037_v58  ;;  %v1167_v1 = vrot.slane %v1159_v49, 6  ;;  %v1169_v2 = vrot.slane %v1160_v52, 5  ;;  %v1171_v3 = vrot.slane %v1161_v53, 4 }
  0x83   : > { %v1166_v5 = vsel %vm197_vm0, %v1165_v61, %v1157_v47  ;;  %v1173_v6 = vrot.slane %v1162_v54, 3  ;;  %v1175_v7 = vrot.slane %v1163_v59, 2  ;;  %v1177_v8 = vrot.slane %v1164_v60, 1 }
  0x84   : > { %1039 = vrot.lane.b32.xlu1 %v1038_v0, %s1887_s28  ;;  %v1168_v10 = vsel %vm200_vm1, %v1167_v1, %v1166_v5  ;;  %v1802_v11 = vpack.c.bf16 %v1185_v50, %v1185_v50  ;;  %v1803_v12 = vpack.c.bf16 %v1186_v55, %v1186_v55  ;;  %v1804_v13 = vpack.c.bf16 %v1187_v56, %v1187_v56 }
  0x85   : > { %v1170_v14 = vsel %vm203_vm2, %v1169_v2, %v1168_v10  ;;  %v1805_v15 = vpack.c.bf16 %v1188_v57, %v1188_v57  ;;  %v1806_v16 = vpack.c.bf16 %v1189_v62, %v1189_v62  ;;  %v1807_v17 = vpack.c.bf16 %v1190_v63, %v1190_v63 }
  0x86   : > { %v1172_v18 = vsel %vm206_vm3, %v1171_v3, %v1170_v14  ;;  %v1808_v19 = vpack.c.bf16 %v1191_v4, %v1191_v4  ;;  %v1809_v20 = vpack.c.bf16 %v1192_v9, %v1192_v9  ;;  %v1225_v21 = vunpack.c.l.b16 %v1802_v11 }
  0x87   : > { %v1174_v22 = vsel %vm209_vm4, %v1173_v6, %v1172_v18  ;;  %v1226_v23 = vunpack.c.l.b16 %v1803_v12  ;;  %v1227_v24 = vunpack.c.l.b16 %v1804_v13  ;;  %v1228_v25 = vunpack.c.l.b16 %v1805_v15 }
  0x88   : > { %v1176_v26 = vsel %vm212_vm5, %v1175_v7, %v1174_v22  ;;  %v1229_v27 = vunpack.c.l.b16 %v1806_v16  ;;  %v1230_v28 = vunpack.c.l.b16 %v1807_v17  ;;  %v1231_v29 = vunpack.c.l.b16 %v1808_v19 }
  0x89   : > { %v1178_v30 = vsel %vm215_vm6, %v1177_v8, %v1176_v26  ;;  %v1232_v31 = vunpack.c.l.b16 %v1809_v20  ;;  %v1233_v32 = vrot.slane %v1226_v23, 7  ;;  %v1235_v33 = vrot.slane %v1227_v24, 6 }
  0x8a   : > { %v1179_v34 = vpack.c.b16 %v1178_v30, %v1178_v30  ;;  %v1237_v35 = vrot.slane %v1228_v25, 5  ;;  %v1239_v36 = vrot.slane %v1229_v27, 4  ;;  %v1241_v38 = vrot.slane %v1230_v28, 3 }
  0x8b   : > { %v1234_v37 = vsel %vm197_vm0, %v1233_v32, %v1225_v21  ;;  %v1243_v40 = vrot.slane %v1231_v29, 2  ;;  %v1889_v41 = vmov 0   ;;  %v1245_v43 = vrot.slane %v1232_v31, 1 }
  0x8c   : > { %1180 = vrot.lane.b32.xlu0 %v1179_v34, %s1888_s29  ;;  %v1236_v39 = vsel %vm200_vm1, %v1235_v33, %v1234_v37  ;;  %145 = vst [vmem:[#allocation2] sm:$0xff] %v1889_v41  ;;  %1429 = vmatprep.mubr.bf16.mxu0 %v1889_v41  ;;  %147 = vst.msk [vmem:[#allocation2 + $0x8] sm:$0xf] %vm146_vm7, %v1889_v41  ;;  %vm561_vm0 = vcmask 1019752   ;;  %vm1113_vm7 = vcmask 1044456   ;;  %v1893_v8 = vmov 0.0  }
  0x8d   : > { %v1238_v42 = vsel %vm203_vm2, %v1237_v35, %v1236_v39  ;;  %vm634_vm1 = vmor %vm633_vm14, %vm632_vm13  ;;  %vm702_vm2 = vcmask 265352   ;;  %vm1251_vm13 = vcmask 396552   ;;  %1816 = vmatprep.subr.bf16.mxu1 %v1893_v8  ;;  %vm1896_vm14 = vmmov 0  }
  0x8e   : > { %v1240_v44 = vsel %vm206_vm3, %v1239_v36, %v1238_v42  ;;  %vm770_vm3 = vcmask 412952   ;;  %1826 = vmatprep.mubr.msk.bf16.mxu1 %vm1896_vm14, %v1893_v8 }
  0x8f   : > { %v1242_v45 = vsel %vm209_vm4, %v1241_v38, %v1240_v44  ;;  %vm838_vm4 = vcmask 560552  }
  0x90   : > { %v1244_v46 = vsel %vm212_vm5, %v1243_v40, %v1242_v45  ;;  %vm906_vm5 = vcmask 708152  }
  0x91   : > { %v1246_v47 = vsel %vm215_vm6, %v1245_v43, %v1244_v46  ;;  %vm974_vm6 = vcmask 855752  }
  0x92   : > { %v1247_v48 = vpack.c.b16 %v1246_v47, %v1246_v47  ;;  %v355_v50 = vpop.permute.xlu1 %354 }
  0x94   : > { %1248 = vrot.lane.b32.xlu1 %v1247_v48, %s1890_s30 }
  0x99   : > { %v219_v49 = vpop.permute.xlu0 %218 }
  0x9a   : > { %222 = vst.msk [vmem:[#allocation2] sm:$0xf] %vm221_vm8, %v219_v49  ;;  %vm1114_vm8 = vcmask 105476  }
  0xa1   : > { %v423_v52 = vpop.permute.xlu1 %422 }
  0xa9   : > { %v287_v51 = vpop.permute.xlu0 %286 }
  0xaa   : > { %290 = vst.msk [vmem:[#allocation2] sm:$0xf] %vm289_vm9, %v287_v51  ;;  %vm1110_vm9 = vcmask 1022976  }
  0xab   : > { %358 = vst.msk [vmem:[#allocation2] sm:$0xf] %vm357_vm10, %v355_v50  ;;  %vm1042_vm10 = vcmask 1003352  }
  0xac   : > { %426 = vst.msk [vmem:[#allocation2] sm:$0xf] %vm425_vm11, %v423_v52  ;;  %vm1115_vm11 = vmor %vm1114_vm8, %vm1113_vm7  ;;  %vm1384_vm7 = vcmask 588800   ;;  %vm1480_vm8 = vcmask 261120  }
  0xb1   : > { %v491_v53 = vpop.permute.xlu1 %490 }
  0xb2   : > { %494 = vst.msk [vmem:[#allocation2] sm:$0xf] %vm493_vm12, %v491_v53  ;;  %vm1183_vm12 = vcmask 248952  }
  0xb8   : > { %v627_v54 = vpop.permute.xlu0 %626 }
  0xb9   : > { %v628_v55 = vrot.slane %v627_v54, 4 }
  0xbb   : > { %v630_v57 = vsel %vm629_vm15, %v628_v55, %v627_v54 }
  0xc0   : > { %v700_v58 = vpop.permute.xlu1 %699 }
  0xc8   : > { %v559_v56 = vpop.permute.xlu0 %558 }
  0xc9   : > { %562 = vst.msk [vmem:[#allocation2] sm:$0xf] %vm561_vm0, %v559_v56  ;;  %vm1286_vm0 = vcmask 900096  }
  0xca   : > { %635 = vst.msk [vmem:[#allocation2] sm:$0xff] %vm634_vm1, %v630_v57  ;;  %vm1334_vm1 = vcmask 1043456  }
  0xcb   : > { %703 = vst.msk [vmem:[#allocation2 + $0x4] sm:$0xf] %vm702_vm2, %v700_v58  ;;  %vm1277_vm2 = vcmask 1031168  }
  0xd0   : > { %v836_v59 = vpop.permute.xlu1 %835 }
  0xd7   : > { %v768_v60 = vpop.permute.xlu0 %767 }
  0xd8   : > { %771 = vst.msk [vmem:[#allocation2 + $0x4] sm:$0xf] %vm770_vm3, %v768_v60  ;;  %vm1304_vm3 = vcmask 883712  }
  0xd9   : > { %839 = vst.msk [vmem:[#allocation2 + $0x4] sm:$0xf] %vm838_vm4, %v836_v59  ;;  %vm1313_vm4 = vcmask 752640  }
  0xdf   : > { %v1108_v63 = vpop.permute.xlu1 %1107 }
  0xe0   : > { %v1109_v0 = vrot.slane %v1108_v63, 4 }
  0xe2   : > { %v1111_v2 = vsel %vm1110_vm9, %v1109_v0, %v1108_v63  ;;  %v1383_v0 = vld [vmem:[%s2222_s1] sm:$0xf] }
  0xe7   : > { %v904_v61 = vpop.permute.xlu0 %903 }
  0xe8   : > { %907 = vst.msk [vmem:[#allocation2 + $0x4] sm:$0xf] %vm906_vm5, %v904_v61  ;;  %vm1322_vm5 = vcmask 744448  }
  0xef   : > { %v972_v62 = vpop.permute.xlu0 %971 }
  0xf0   : > { %975 = vst.msk [vmem:[#allocation2 + $0x4] sm:$0xf] %vm974_vm6, %v972_v62  ;;  %vm1331_vm6 = vcmask 736256  }
  0xf6   : > { %v1040_v1 = vpop.permute.xlu1 %1039 }
  0xf7   : > { %1043 = vst.msk [vmem:[#allocation2 + $0x4] sm:$0xf] %vm1042_vm10, %v1040_v1 }
  0xf8   : > { %1116 = vst.msk [vmem:[#allocation2 + $0x4] sm:$0xff] %vm1115_vm11, %v1111_v2 }
  0xfe   : > { %v1181_v3 = vpop.permute.xlu0 %1180 }
  0xff   : > { %v1253_v4 = vld [vmem:[#allocation2] sm:$0xff]  ;;  %1184 = vst.msk [vmem:[#allocation2 + $0x8] sm:$0xf] %vm1183_vm12, %v1181_v3 }
 0x100   : > { %v1674_v5 = vcombine.high %v1253_v4, %v1253_v4  ;;  %v1673_v6 = vcombine.low %v1253_v4, %v1253_v4 }
 0x102   : > { %1273 = vrot.lane.b32.xlu1 %v1674_v5, %s1891_s3  ;;  %1265 = vrot.lane.b32.xlu0 %v1674_v5, %s1879_s20 }
 0x106   : > { %1282 = vrot.lane.b32.xlu1 %v1674_v5, %s1892_s4  ;;  %1263 = vrot.lane.b32.xlu0 %v1673_v6, %s1879_s20  ;;  %v1249_v7 = vpop.permute.xlu1 %1248 }
 0x107   : > { %1252 = vst.msk [vmem:[#allocation2 + $0x8] sm:$0xf] %vm1251_vm13, %v1249_v7 }
 0x10a   : > { %1271 = vrot.lane.b32.xlu1 %v1673_v6, %s1891_s3  ;;  %1280 = vrot.lane.b32.xlu0 %v1673_v6, %s1892_s4 }
 0x10e   : > { %v1865_v9 = vld [vmem:[#allocation2 + $0x8] ss:$0 sps:$4 sm:$0xff]   ;;  %1291 = vrot.lane.b32.xlu1 %v1674_v5, %s1881_s22  ;;  %1298 = vrot.lane.b32.xlu0 %v1673_v6, %s1894_s5 }
 0x112   : > { %1300 = vrot.lane.b32.xlu1 %v1674_v5, %s1894_s5  ;;  %1275 = vrot.lane.b32.xlu0 %v1865_v9, %s1891_s3 }
 0x116   : > { %1289 = vrot.lane.b32.xlu1 %v1673_v6, %s1881_s22  ;;  %1284 = vrot.lane.b32.xlu0 %v1865_v9, %s1892_s4 }
 0x11a   : > { %1293 = vrot.lane.b32.xlu0 %v1865_v9, %s1881_s22  ;;  %1267 = vrot.lane.b32.xlu1 %v1865_v9, %s1879_s20 }
 0x11e   : > { %1302 = vrot.lane.b32.xlu0 %v1865_v9, %s1894_s5  ;;  %1309 = vrot.lane.b32.xlu1 %v1674_v5, %s1895_s6 }
 0x122   : > { %1311 = vrot.lane.b32.xlu0 %v1865_v9, %s1895_s6  ;;  %1318 = vrot.lane.b32.xlu1 %v1674_v5, %s1878_s19 }
 0x126   : > { %1320 = vrot.lane.b32.xlu0 %v1865_v9, %s1878_s19  ;;  %1307 = vrot.lane.b32.xlu1 %v1673_v6, %s1895_s6 }
 0x12a   : > { %1316 = vrot.lane.b32.xlu0 %v1673_v6, %s1878_s19  ;;  %1325 = vrot.lane.b32.xlu1 %v1673_v6, %s1897_s7 }
 0x12e   : > { %1327 = vrot.lane.b32.xlu0 %v1674_v5, %s1897_s7  ;;  %1329 = vrot.lane.b32.xlu1 %v1865_v9, %s1897_s7 }
 0x174   : > { %v1274_v10 = vpop.permute.xlu1 %1273  ;;  %v1266_v11 = vpop.permute.xlu0 %1265 }
 0x178   : > { %v1283_v12 = vpop.permute.xlu1 %1282  ;;  %v1264_v13 = vpop.permute.xlu0 %1263 }
 0x179   : > { %v1269_v22 = vsel %vm629_vm15, %v1264_v13, %v1266_v11 }
 0x17a   : > { %v1337_v30 = vsel %vm1334_vm1, %v1673_v6, %v1269_v22 }
 0x17c   : > { %v1272_v14 = vpop.permute.xlu1 %1271  ;;  %v1281_v15 = vpop.permute.xlu0 %1280 }
 0x17d   : > { %v1278_v31 = vsel %vm1277_vm2, %v1272_v14, %v1274_v10  ;;  %v1287_v32 = vsel %vm1286_vm0, %v1281_v15, %v1283_v12 }
 0x17e   : > { %v1349_v39 = vsel %vm1334_vm1, %v1278_v31, %v1287_v32 }
 0x180   : > { %v1292_v16 = vpop.permute.xlu1 %1291  ;;  %v1299_v17 = vpop.permute.xlu0 %1298 }
 0x184   : > { %v1301_v18 = vpop.permute.xlu1 %1300  ;;  %v1276_v19 = vpop.permute.xlu0 %1275 }
 0x185   : > { %v1279_v29 = vsel %vm1277_vm2, %v1274_v10, %v1276_v19  ;;  %v1305_v45 = vsel %vm1304_vm3, %v1299_v17, %v1301_v18 }
 0x188   : > { %v1290_v20 = vpop.permute.xlu1 %1289  ;;  %v1285_v21 = vpop.permute.xlu0 %1284 }
 0x189   : > { %v1288_v25 = vsel %vm1286_vm0, %v1283_v12, %v1285_v21  ;;  %v1357_v37 = vsel %vm1334_vm1, %v1276_v19, %v1285_v21 }
 0x18a   : > { %v1353_v35 = vsel %vm1334_vm1, %v1279_v29, %v1288_v25 }
 0x18c   : > { %v1268_v23 = vpop.permute.xlu1 %1267  ;;  %v1294_v24 = vpop.permute.xlu0 %1293 }
 0x18d   : > { %v1270_v26 = vsel %vm629_vm15, %v1266_v11, %v1268_v23  ;;  %v1345_v27 = vsel %vm1334_vm1, %v1865_v9, %v1268_v23  ;;  %vm1295_vm15 = vcmask 891904  }
 0x18e   : > { %1817 = vmatpush3.bf16.msra.mxu1 %v1345_v27  ;;  %v1341_v28 = vsel %vm1334_vm1, %v1674_v5, %v1270_v26  ;;  %v1297_v38 = vsel %vm1295_vm15, %v1292_v16, %v1294_v24  ;;  %v1296_v40 = vsel %vm1295_vm15, %v1290_v20, %v1292_v16 }
 0x18f   : > { %1397 = vmatprep.subr.bf16.mxu0 %v1341_v28  ;;  %1818 = vmatprep.subr.bf16.mxu1 %v1893_v8  ;;  %v1361_v46 = vsel %vm1334_vm1, %v1296_v40, %v1305_v45 }
 0x190   : > { %v1310_v33 = vpop.permute.xlu1 %1309  ;;  %1398 = vmatpush1.bf16.msra.mxu0 %v1337_v30  ;;  %v1303_v34 = vpop.permute.xlu0 %1302 }
 0x191   : > { %v1306_v36 = vsel %vm1304_vm3, %v1301_v18, %v1303_v34  ;;  %1399 = vmatprep.subr.bf16.mxu0 %v1353_v35  ;;  %v1369_v44 = vsel %vm1334_vm1, %v1294_v24, %v1303_v34 }
 0x192   : > { %1819 = vmatpush3.bf16.msra.mxu1 %v1357_v37  ;;  %v1365_v43 = vsel %vm1334_vm1, %v1297_v38, %v1306_v36 }
 0x193   : > { %1820 = vmatprep.subr.bf16.mxu1 %v1893_v8 }
 0x194   : > { %v1319_v41 = vpop.permute.xlu1 %1318  ;;  %1400 = vmatpush1.bf16.msra.mxu0 %v1349_v39  ;;  %v1312_v42 = vpop.permute.xlu0 %1311 }
 0x195   : > { %1401 = vmatprep.subr.bf16.mxu0 %v1365_v43  ;;  %v1315_v49 = vsel %vm1313_vm4, %v1310_v33, %v1312_v42 }
 0x196   : > { %1821 = vmatpush3.bf16.msra.mxu1 %v1369_v44 }
 0x197   : > { %1822 = vmatprep.subr.bf16.mxu1 %v1893_v8 }
 0x198   : > { %v1308_v47 = vpop.permute.xlu1 %1307  ;;  %1402 = vmatpush1.bf16.msra.mxu0 %v1361_v46  ;;  %v1321_v48 = vpop.permute.xlu0 %1320 }
 0x199   : > { %v1324_v50 = vsel %vm1322_vm5, %v1319_v41, %v1321_v48  ;;  %v1381_v51 = vsel %vm1334_vm1, %v1312_v42, %v1321_v48  ;;  %v1314_v55 = vsel %vm1313_vm4, %v1308_v47, %v1310_v33 }
 0x19a   : > { %1823 = vmatpush3.bf16.msra.mxu1 %v1381_v51  ;;  %v1377_v52 = vsel %vm1334_vm1, %v1315_v49, %v1324_v50 }
 0x19b   : > { %1403 = vmatprep.subr.bf16.mxu0 %v1377_v52  ;;  %1824 = vmatprep.subr.bf16.mxu1 %v1893_v8 }
 0x19c   : > { %v1326_v53 = vpop.permute.xlu1 %1325  ;;  %v1317_v54 = vpop.permute.xlu0 %1316 }
 0x19d   : > { %v1323_v56 = vsel %vm1322_vm5, %v1317_v54, %v1319_v41 }
 0x19e   : > { %v1373_v57 = vsel %vm1334_vm1, %v1314_v55, %v1323_v56 }
 0x19f   : > { %1404 = vmatpush1.bf16.msra.mxu0 %v1373_v57 }
 0x1a0   : > { %v1330_v58 = vpop.permute.xlu1 %1329  ;;  %v1328_v59 = vpop.permute.xlu0 %1327 }
 0x1a1   : > { %v1395_v60 = vsel %vm1334_vm1, %v1330_v58, 0  ;;  %v1332_v61 = vsel %vm1331_vm6, %v1326_v53, %v1328_v59  ;;  %v1333_v62 = vsel %vm1331_vm6, %v1328_v59, %v1330_v58 }
 0x1a2   : > { %1676 = vmatprep.subr.msk.bf16.mxu0 %vm1334_vm1, %v1333_v62  ;;  %1825 = vmatpush3.bf16.msra.mxu1 %v1395_v60  ;;  %v1389_v63 = vsel %vm1334_vm1, %v1332_v61, 0 }
 0x1a3   : > { %1406 = vmatpush1.bf16.msra.mxu0 %v1389_v63 }
 0x1a5   : > { %1827 = vmatmul.mubr.msk.bf16.vlgmr.msra.gmra.mrb[0].mxu1 %vm1384_vm7, %v1383_v0 }
 0x1a6   : > { %1677 = vmatmul.mubr.msk.bf16.vlgmr.msra.gmra.mrb[0].mxu0 %vm1384_vm7, %v1383_v0 }
 0x278   : > { %v1472_v1 = vpop.f32.mrb[0].mxu1 }
 0x279   : > { %1481 = vst.msk [vmem:[%s143_s15 + $0x10] sm:$0xff] %vm1480_vm8, %v1472_v1  ;;  %v1431_v2 = vpop.f32.mrb[0].mxu0  ;;  %v1828_v3 = vpop.f32.mrb[1].mxu1 }
 0x27a   : > { %1478 = vst [vmem:[%s143_s15] sm:$0xff] %v1431_v2  ;;  %v1433_v4 = vpop.f32.mrb[1].mxu0  ;;  %v1475_v5 = vpop.f32.mrb[2].mxu1 }
 0x27b   : > { %1479 = vst [vmem:[%s143_s15 + $0x8] sm:$0xff] %v1433_v4  ;;  %v1435_v6 = vpop.f32.mrb[2].mxu0  ;;  %v1829_v7 = vpop.f32.mrb[3].mxu1 }
 0x27c   : > { %v1436_v8 = vpop.f32.mrb[3].mxu0 }
 0x27d PF: > { %s12_s9 = sadd.s32 1, %s1872_s9  }
 0x27e   : > { %p9_p4 = scmp.ge.s32.totalorder %s12_s9, 4  }
 0x280   :  { %11 = sbr.rel (!%p9_p4) target bundleno = 1 (0x1), region = 58 }

</bundles_post_ra>
